<compile_context>
chip_gen: v7x
topology: tpu7x:2x2x1
jax: 0.10.0
libtpu: 0.0.40
codegen_flags: <defaults>
</compile_context>

<pallas_src>
import functools

import jax
import jax.numpy as jnp
from jax.experimental import pallas as pl
from jax.experimental.pallas import tpu as pltpu


def _msa_kernel(x_ref, wq_ref, wk_ref, wv_ref, bqkv_ref, wout_ref, bout_ref,
                bias_ref, o_ref, *, n_heads, head_dim, n_win, n_tok):
    """One grid step: G windows x NP tokens of window attention + output projection."""
    G, NP, D, H = n_win, n_tok, head_dim, n_heads
    C = H * D
    R = G * NP

    # x arrives f32 from HBM; cast to bf16 in-kernel (free VPU op, no extra XLA pass).
    xb = x_ref[...].astype(jnp.bfloat16)                         # (R, C)
    b_all = bqkv_ref[...]                                        # (3, C) f32

    def project_to_heads(w_ref, row):
        # One (R, C) @ (C, C) MXU matmul for all windows/heads of this block, then a
        # once-per-step relayout to (G*H, NP, D) so attention is a single batched
        # matmul over all (window, head) pairs (no per-head lane slices/relayouts).
        t = jnp.dot(xb, w_ref[...], preferred_element_type=jnp.float32)
        t = t + b_all[row:row + 1, :]                            # f32 (R, C)
        t = t.reshape(G, NP, C)                                  # leading split: free
        t = jnp.swapaxes(t, 1, 2)                                # (G, C, NP) minor transpose
        t = t.reshape(G * H, D, NP)                              # sublane-tile split (D % 8 == 0)
        t = jnp.swapaxes(t, 1, 2)                                # (G*H, NP, D) minor transpose
        return t.astype(jnp.bfloat16)

    q = project_to_heads(wq_ref, 0)   # 1/sqrt(D) pre-folded into wq/bq by the wrapper
    k = project_to_heads(wk_ref, 1)
    v = project_to_heads(wv_ref, 2)

    # Batched attention over all G*H (window, head) pairs.
    sim = jnp.einsum("bpd,bqd->bpq", q, k, preferred_element_type=jnp.float32)
    sim = (sim.reshape(G, H, NP, NP) + bias_ref[...][None]).reshape(G * H, NP, NP)
    sim = sim - jnp.max(sim, axis=-1, keepdims=True)             # f32 softmax
    p = jnp.exp(sim)
    p = p * pl.reciprocal(jnp.sum(p, axis=-1, keepdims=True), approx=True)
    o = jnp.einsum("bpq,bqd->bpd", p.astype(jnp.bfloat16), v,
                   preferred_element_type=jnp.float32)           # (G*H, NP, D) f32

    # Back to (R, C) rows (heads concatenated along lanes) for a single K=C out matmul.
    o = jnp.swapaxes(o, 1, 2)                                    # (G*H, D, NP)
    o = o.reshape(G, C, NP)                                      # sublane-tile merge
    o = jnp.swapaxes(o, 1, 2).reshape(R, C)                      # (R, C)

    out = jnp.dot(o.astype(jnp.bfloat16), wout_ref[...],
                  preferred_element_type=jnp.float32) + bout_ref[...]
    o_ref[...] = out.astype(o_ref.dtype)


def _round_up(x, m):
    return (x + m - 1) // m * m


def _tpu_generation_info():
    """(TensorCores sharing the parallel grid, per-core VMEM bytes) — best effort."""
    kind = ""
    try:
        kind = jax.devices()[0].device_kind.lower()
    except Exception:
        pass
    if "v7" in kind:
        return 2, 64 * 1024 * 1024                 # v7x: 2 TCs/chip, 64 MiB VMEM/TC
    if any(s in kind for s in ("v5e", "v5 lite", "v5lite", "v6e", "v6 lite", "v6lite")):
        return 1, 128 * 1024 * 1024                # v5e / v6e: single TensorCore
    return 2, 128 * 1024 * 1024                    # v4 / v5p megacore or unknown


def _select_block_windows(total_windows, n_tok, row_bytes, *, min_steps, max_rows,
                          vmem_block_budget):
    """Largest divisor G of total_windows whose (G * n_tok)-row block fits the VMEM
    budget while leaving >= min_steps grid steps (>= 2 per TensorCore on multi-TC
    chips so input/output double-buffers overlap DMA with compute; 1 on single-TC)."""
    cap_rows = min(max_rows, max(n_tok, vmem_block_budget // max(1, row_bytes)))
    max_g = max(1, cap_rows // n_tok)
    divisors = [g for g in range(1, total_windows + 1) if total_windows % g == 0]
    fitting = [g for g in divisors if g <= max_g]
    good = [g for g in fitting if total_windows // g >= min_steps]
    if good:
        return max(good)
    return max(fitting) if fitting else 1


def msa_forward(x, wqkv_t, bqkv, wout_t, bout, rel_bias, *, n_heads, head_dim):
    """x: (B, NW, NP, C) float32 -> (B, NW, NP, OUT).  Window attention (type='W')."""
    B, NW, NP, C = x.shape
    assert C == n_heads * head_dim
    OUT = wout_t.shape[1]
    scale = float(head_dim) ** (-0.5)
    total = B * NW
    rows_total = total * NP

    n_cores, vmem_bytes = _tpu_generation_info()
    min_steps = 1 if n_cores <= 1 else 2 * n_cores

    # Lane-dense output stores only when OUT actually needs padding.
    OUT_PAD = OUT if OUT % 128 == 0 else _round_up(OUT, 128)

    # Rough per-row VMEM footprint: double-buffered x/out blocks + single-buffered
    # in-kernel intermediates (q/k/v, head relayouts, attention logits).
    row_bytes = 2 * 4 * (C + OUT_PAD) + 4 * (8 * C + 2 * n_heads * NP)
    block_budget = max(1 << 20, vmem_bytes // 2 - (8 << 20))
    G = _select_block_windows(total, NP, row_bytes, min_steps=min_steps,
                              max_rows=2048, vmem_block_budget=block_budget)
    num_steps = total // G
    BLK = G * NP

    # One-time parameter prep (host/XLA side).  x stays f32 (cast to bf16 in-kernel).
    x_rows = x.reshape(rows_total, C)
    wq = (wqkv_t[:, :C] * scale).astype(jnp.bfloat16)   # fold 1/sqrt(D) into q proj
    wk = wqkv_t[:, C:2 * C].astype(jnp.bfloat16)
    wv = wqkv_t[:, 2 * C:].astype(jnp.bfloat16)
    bqkv3 = jnp.stack([bqkv[:C] * scale, bqkv[C:2 * C], bqkv[2 * C:]]
                      ).astype(jnp.float32)             # (3, C)
    wout_pad = jnp.zeros((C, OUT_PAD), jnp.float32).at[:, :OUT].set(wout_t)
    wout_pad = wout_pad.astype(jnp.bfloat16)
    bout_pad = jnp.zeros((1, OUT_PAD), jnp.float32).at[:, :OUT].set(bout.reshape(1, OUT))
    bias = rel_bias.astype(jnp.float32)

    kernel = functools.partial(_msa_kernel, n_heads=n_heads, head_dim=head_dim,
                               n_win=G, n_tok=NP)

    block_bytes = BLK * 4 * (C + OUT_PAD)
    vmem_limit = int(min(0.9 * vmem_bytes, max(32 << 20, 4 * block_bytes + (8 << 20))))

    def run(single_buffer_weights):
        def wspec(shape):
            zeros = (0,) * len(shape)
            if single_buffer_weights:
                # Grid-invariant weights: one VMEM buffer is enough; frees headroom
                # for bigger x/out blocks (matters on v7x's 64 MiB VMEM).
                return pl.BlockSpec(shape, lambda i: zeros,
                                    pipeline_mode=pl.Buffered(1))
            return pl.BlockSpec(shape, lambda i: zeros)

        return pl.pallas_call(
            kernel,
            out_shape=jax.ShapeDtypeStruct((rows_total, OUT_PAD), jnp.float32),
            grid_spec=pltpu.PrefetchScalarGridSpec(
                num_scalar_prefetch=0,
                grid=(num_steps,),
                in_specs=[
                    pl.BlockSpec((BLK, C), lambda i: (i, 0)),       # x rows (f32)
                    wspec((C, C)),                                  # Wq^T (pre-scaled)
                    wspec((C, C)),                                  # Wk^T
                    wspec((C, C)),                                  # Wv^T
                    wspec((3, C)),                                  # q/k/v biases
                    wspec((C, OUT_PAD)),                            # Wout^T (lane-padded)
                    wspec((1, OUT_PAD)),                            # bout
                    wspec((n_heads, NP, NP)),                       # rel-pos bias
                ],
                out_specs=pl.BlockSpec((BLK, OUT_PAD), lambda i: (i, 0)),
            ),
            compiler_params=pltpu.CompilerParams(
                dimension_semantics=("parallel",),
                vmem_limit_bytes=vmem_limit),
        )(x_rows, wq, wk, wv, bqkv3, wout_pad, bout_pad, bias)

    try:
        out_rows = run(True)
        out_rows.block_until_ready()
    except Exception:
        # pl.Buffered(1) unsupported on this jax/libtpu combo: fall back to the
        # default double-buffered weight specs (identical numerics).
        out_rows = run(False)

    if OUT_PAD != OUT:
        out_rows = out_rows[:, :OUT]
    return out_rows.reshape(B, NW, NP, OUT)


def relative_embedding(rel_params, window_size):
    """rel_params: (n_heads, 2*ws-1, 2*ws-1) -> (n_heads, ws*ws, ws*ws)."""
    ws = window_size
    ii, jj = jnp.meshgrid(jnp.arange(ws), jnp.arange(ws), indexing="ij")
    cord = jnp.stack([ii.reshape(-1), jj.reshape(-1)], axis=-1)      # (ws*ws, 2)
    relation = cord[:, None, :] - cord[None, :, :] + ws - 1          # (P, P, 2)
    return rel_params[:, relation[..., 0], relation[..., 1]]         # (h, P, P)


def msa_reference(x, wqkv_t, bqkv, wout_t, bout, rel_bias, *, n_heads, head_dim):
    B, NW, NP, C = x.shape
    qkv = x @ wqkv_t + bqkv                                          # (B,NW,NP,3C)
    qkv = qkv.reshape(B, NW, NP, 3 * n_heads, head_dim)
    qkv = jnp.transpose(qkv, (3, 0, 1, 2, 4))                        # (3h,B,NW,NP,hd)
    q, k, v = qkv[:n_heads], qkv[n_heads:2 * n_heads], qkv[2 * n_heads:]
    sim = jnp.einsum("hbwpc,hbwqc->hbwpq", q, k) * (head_dim ** -0.5)
    sim = sim + rel_bias[:, None, None]
    probs = jax.nn.softmax(sim, axis=-1)
    out = jnp.einsum("hbwij,hbwjc->hbwic", probs, v)
    out = jnp.transpose(out, (1, 2, 3, 0, 4)).reshape(B, NW, NP, n_heads * head_dim)
    return out @ wout_t + bout


if __name__ == "__main__":
    # Module hyper-parameters (small but consistent with MSA semantics).
    input_dim = 32
    output_dim = 32
    head_dim = 8
    n_heads = input_dim // head_dim            # 4
    window_size = 4
    NP = window_size * window_size             # 16 tokens per window
    B, NW = 2, 4                               # batch, number of windows

    key = jax.random.PRNGKey(0)
    k_x, k_wqkv, k_bqkv, k_wout, k_bout, k_rel = jax.random.split(key, 6)

    x = jax.random.normal(k_x, (B, NW, NP, input_dim), dtype=jnp.float32)

    # Deterministic parameter init (shapes from MSA.__init__).
    wqkv_t = jax.random.normal(k_wqkv, (input_dim, 3 * input_dim), jnp.float32) * 0.05
    bqkv = jax.random.normal(k_bqkv, (3 * input_dim,), jnp.float32) * 0.02
    wout_t = jax.random.normal(k_wout, (input_dim, output_dim), jnp.float32) * 0.05
    bout = jax.random.normal(k_bout, (output_dim,), jnp.float32) * 0.02
    # relative_position_params after the view/transposes: (n_heads, 2ws-1, 2ws-1)
    rel_params = jax.random.normal(
        k_rel, (n_heads, 2 * window_size - 1, 2 * window_size - 1), jnp.float32) * 0.02

    rel_bias = relative_embedding(rel_params, window_size)            # (h, NP, NP)

    out = msa_forward(x, wqkv_t, bqkv, wout_t, bout, rel_bias,
                      n_heads=n_heads, head_dim=head_dim)
    out = jax.block_until_ready(out)

    ref = msa_reference(x, wqkv_t, bqkv, wout_t, bout, rel_bias,
                        n_heads=n_heads, head_dim=head_dim)
    assert out.shape == (B, NW, NP, output_dim)
    # bf16 MXU inputs (f32 accumulation) -> compare at bf16-level tolerance.
    assert jnp.allclose(out, ref, atol=1e-2, rtol=1e-2), "mismatch vs JAX reference"

    print("KERNEL_OK")
</pallas_src>

<mosaic_0001>
module attributes {stable_mosaic.version = 11 : i64} {
  func.func @_msa_kernel(%arg0: i32, %arg1: memref<32x32xf32, #tpu.memory_space<vmem>>, %arg2: memref<32x32xbf16, #tpu.memory_space<vmem>>, %arg3: memref<32x32xbf16, #tpu.memory_space<vmem>>, %arg4: memref<32x32xbf16, #tpu.memory_space<vmem>>, %arg5: memref<3x32xf32, #tpu.memory_space<vmem>>, %arg6: memref<32x128xbf16, #tpu.memory_space<vmem>>, %arg7: memref<1x128xf32, #tpu.memory_space<vmem>>, %arg8: memref<4x16x16xf32, #tpu.memory_space<vmem>>, %arg9: memref<32x128xf32, #tpu.memory_space<vmem>>) attributes {dimension_semantics = [#tpu.dimension_semantics<parallel>], iteration_bounds = array<i64: 4>, scalar_prefetch = 0 : i64, scratch_operands = 0 : i64, tpu.core_type = #tpu.core_type<tc>, window_params = [{transform_indices = @transform_0, window_bounds = array<i64: 32, 32>}, {pipeline_mode = #tpu.pipeline_mode<synchronous>, transform_indices = @transform_1, window_bounds = array<i64: 32, 32>}, {pipeline_mode = #tpu.pipeline_mode<synchronous>, transform_indices = @transform_2, window_bounds = array<i64: 32, 32>}, {pipeline_mode = #tpu.pipeline_mode<synchronous>, transform_indices = @transform_3, window_bounds = array<i64: 32, 32>}, {pipeline_mode = #tpu.pipeline_mode<synchronous>, transform_indices = @transform_4, window_bounds = array<i64: 3, 32>}, {pipeline_mode = #tpu.pipeline_mode<synchronous>, transform_indices = @transform_5, window_bounds = array<i64: 32, 128>}, {pipeline_mode = #tpu.pipeline_mode<synchronous>, transform_indices = @transform_6, window_bounds = array<i64: 1, 128>}, {pipeline_mode = #tpu.pipeline_mode<synchronous>, transform_indices = @transform_7, window_bounds = array<i64: 4, 16, 16>}, {transform_indices = @transform_8, window_bounds = array<i64: 32, 128>}]} {
    %c0 = arith.constant 0 : index
    %c0_0 = arith.constant 0 : index
    %0 = vector.load %arg1[%c0, %c0_0] : memref<32x32xf32, #tpu.memory_space<vmem>>, vector<32x32xf32>
    %1 = arith.truncf %0 : vector<32x32xf32> to vector<32x32xbf16>
    %c0_1 = arith.constant 0 : index
    %c0_2 = arith.constant 0 : index
    %2 = vector.load %arg5[%c0_1, %c0_2] : memref<3x32xf32, #tpu.memory_space<vmem>>, vector<3x32xf32>
    %c0_3 = arith.constant 0 : index
    %c0_4 = arith.constant 0 : index
    %3 = vector.load %arg2[%c0_3, %c0_4] : memref<32x32xbf16, #tpu.memory_space<vmem>>, vector<32x32xbf16>
    %cst = arith.constant dense<0.000000e+00> : vector<32x32xf32>
    %4 = tpu.matmul %1, %3, %cst {dimension_numbers = #tpu.dot_dimension_numbers<[1], [0], [0], [1], [0, 0, 1, 1], [], []>} : vector<32x32xbf16>, vector<32x32xbf16>, vector<32x32xf32> -> vector<32x32xf32>
    %5 = vector.extract_strided_slice %2 {offsets = [0, 0], sizes = [1, 32], strides = [1, 1]} : vector<3x32xf32> to vector<1x32xf32>
    %6 = vector.broadcast %5 : vector<1x32xf32> to vector<32x32xf32>
    %7 = arith.addf %4, %6 : vector<32x32xf32>
    %8 = vector.shape_cast %7 : vector<32x32xf32> to vector<2x16x32xf32>
    %9 = tpu.transpose %8, [0, 2, 1] : vector<2x16x32xf32> -> vector<2x32x16xf32>
    %10 = vector.shape_cast %9 : vector<2x32x16xf32> to vector<8x8x16xf32>
    %11 = tpu.transpose %10, [0, 2, 1] : vector<8x8x16xf32> -> vector<8x16x8xf32>
    %12 = arith.truncf %11 : vector<8x16x8xf32> to vector<8x16x8xbf16>
    %c0_5 = arith.constant 0 : index
    %c0_6 = arith.constant 0 : index
    %13 = vector.load %arg3[%c0_5, %c0_6] : memref<32x32xbf16, #tpu.memory_space<vmem>>, vector<32x32xbf16>
    %cst_7 = arith.constant dense<0.000000e+00> : vector<32x32xf32>
    %14 = tpu.matmul %1, %13, %cst_7 {dimension_numbers = #tpu.dot_dimension_numbers<[1], [0], [0], [1], [0, 0, 1, 1], [], []>} : vector<32x32xbf16>, vector<32x32xbf16>, vector<32x32xf32> -> vector<32x32xf32>
    %15 = vector.extract_strided_slice %2 {offsets = [1, 0], sizes = [1, 32], strides = [1, 1]} : vector<3x32xf32> to vector<1x32xf32>
    %16 = vector.broadcast %15 : vector<1x32xf32> to vector<32x32xf32>
    %17 = arith.addf %14, %16 : vector<32x32xf32>
    %18 = vector.shape_cast %17 : vector<32x32xf32> to vector<2x16x32xf32>
    %19 = tpu.transpose %18, [0, 2, 1] : vector<2x16x32xf32> -> vector<2x32x16xf32>
    %20 = vector.shape_cast %19 : vector<2x32x16xf32> to vector<8x8x16xf32>
    %21 = tpu.transpose %20, [0, 2, 1] : vector<8x8x16xf32> -> vector<8x16x8xf32>
    %22 = arith.truncf %21 : vector<8x16x8xf32> to vector<8x16x8xbf16>
    %c0_8 = arith.constant 0 : index
    %c0_9 = arith.constant 0 : index
    %23 = vector.load %arg4[%c0_8, %c0_9] : memref<32x32xbf16, #tpu.memory_space<vmem>>, vector<32x32xbf16>
    %cst_10 = arith.constant dense<0.000000e+00> : vector<32x32xf32>
    %24 = tpu.matmul %1, %23, %cst_10 {dimension_numbers = #tpu.dot_dimension_numbers<[1], [0], [0], [1], [0, 0, 1, 1], [], []>} : vector<32x32xbf16>, vector<32x32xbf16>, vector<32x32xf32> -> vector<32x32xf32>
    %25 = vector.extract_strided_slice %2 {offsets = [2, 0], sizes = [1, 32], strides = [1, 1]} : vector<3x32xf32> to vector<1x32xf32>
    %26 = vector.broadcast %25 : vector<1x32xf32> to vector<32x32xf32>
    %27 = arith.addf %24, %26 : vector<32x32xf32>
    %28 = vector.shape_cast %27 : vector<32x32xf32> to vector<2x16x32xf32>
    %29 = tpu.transpose %28, [0, 2, 1] : vector<2x16x32xf32> -> vector<2x32x16xf32>
    %30 = vector.shape_cast %29 : vector<2x32x16xf32> to vector<8x8x16xf32>
    %31 = tpu.transpose %30, [0, 2, 1] : vector<8x8x16xf32> -> vector<8x16x8xf32>
    %32 = arith.truncf %31 : vector<8x16x8xf32> to vector<8x16x8xbf16>
    "tpu.trace_start"() <{level = 10 : i32, message = "bpd,bqd->bpq"}> : () -> ()
    %cst_11 = arith.constant dense<0.000000e+00> : vector<8x16x16xf32>
    %33 = tpu.matmul %12, %22, %cst_11 {dimension_numbers = #tpu.dot_dimension_numbers<[2], [2], [1], [1], [0, 0, 0, 1, 1, 1], [0], [0]>} : vector<8x16x8xbf16>, vector<8x16x8xbf16>, vector<8x16x16xf32> -> vector<8x16x16xf32>
    "tpu.trace_stop"() : () -> ()
    %34 = vector.shape_cast %33 : vector<8x16x16xf32> to vector<2x4x16x16xf32>
    %c0_12 = arith.constant 0 : index
    %c0_13 = arith.constant 0 : index
    %c0_14 = arith.constant 0 : index
    %35 = vector.load %arg8[%c0_12, %c0_13, %c0_14] : memref<4x16x16xf32, #tpu.memory_space<vmem>>, vector<4x16x16xf32>
    %36 = vector.shape_cast %35 : vector<4x16x16xf32> to vector<1x4x16x16xf32>
    %37 = vector.broadcast %36 : vector<1x4x16x16xf32> to vector<2x4x16x16xf32>
    %38 = arith.addf %34, %37 : vector<2x4x16x16xf32>
    %39 = vector.shape_cast %38 : vector<2x4x16x16xf32> to vector<8x16x16xf32>
    %cst_15 = arith.constant dense<0xFF800000> : vector<8x16xf32>
    %40 = vector.multi_reduction <maximumf>, %39, %cst_15 [2] : vector<8x16x16xf32> to vector<8x16xf32>
    %41 = vector.shape_cast %40 : vector<8x16xf32> to vector<8x16x1xf32>
    %42 = vector.broadcast %41 : vector<8x16x1xf32> to vector<8x16x16xf32>
    %43 = arith.subf %39, %42 : vector<8x16x16xf32>
    %44 = math.exp %43 : vector<8x16x16xf32>
    %cst_16 = arith.constant dense<0.000000e+00> : vector<8x16xf32>
    %45 = vector.multi_reduction <add>, %44, %cst_16 [2] : vector<8x16x16xf32> to vector<8x16xf32>
    %46 = vector.shape_cast %45 : vector<8x16xf32> to vector<8x16x1xf32>
    %47 = tpu.reciprocal %46 {approx = true} : vector<8x16x1xf32> -> vector<8x16x1xf32>
    %48 = vector.broadcast %47 : vector<8x16x1xf32> to vector<8x16x16xf32>
    %49 = arith.mulf %44, %48 : vector<8x16x16xf32>
    %50 = arith.truncf %49 : vector<8x16x16xf32> to vector<8x16x16xbf16>
    "tpu.trace_start"() <{level = 10 : i32, message = "bpq,bqd->bpd"}> : () -> ()
    %cst_17 = arith.constant dense<0.000000e+00> : vector<8x16x8xf32>
    %51 = tpu.matmul %50, %32, %cst_17 {dimension_numbers = #tpu.dot_dimension_numbers<[2], [1], [1], [2], [0, 0, 0, 1, 1, 2], [0], [0]>} : vector<8x16x16xbf16>, vector<8x16x8xbf16>, vector<8x16x8xf32> -> vector<8x16x8xf32>
    "tpu.trace_stop"() : () -> ()
    %52 = tpu.transpose %51, [0, 2, 1] : vector<8x16x8xf32> -> vector<8x8x16xf32>
    %53 = vector.shape_cast %52 : vector<8x8x16xf32> to vector<2x32x16xf32>
    %54 = tpu.transpose %53, [0, 2, 1] : vector<2x32x16xf32> -> vector<2x16x32xf32>
    %55 = vector.shape_cast %54 : vector<2x16x32xf32> to vector<32x32xf32>
    %56 = arith.truncf %55 : vector<32x32xf32> to vector<32x32xbf16>
    %c0_18 = arith.constant 0 : index
    %c0_19 = arith.constant 0 : index
    %57 = vector.load %arg6[%c0_18, %c0_19] : memref<32x128xbf16, #tpu.memory_space<vmem>>, vector<32x128xbf16>
    %cst_20 = arith.constant dense<0.000000e+00> : vector<32x128xf32>
    %58 = tpu.matmul %56, %57, %cst_20 {dimension_numbers = #tpu.dot_dimension_numbers<[1], [0], [0], [1], [0, 0, 1, 1], [], []>} : vector<32x32xbf16>, vector<32x128xbf16>, vector<32x128xf32> -> vector<32x128xf32>
    %c0_21 = arith.constant 0 : index
    %c0_22 = arith.constant 0 : index
    %59 = vector.load %arg7[%c0_21, %c0_22] : memref<1x128xf32, #tpu.memory_space<vmem>>, vector<1x128xf32>
    %60 = vector.broadcast %59 : vector<1x128xf32> to vector<32x128xf32>
    %61 = arith.addf %58, %60 : vector<32x128xf32>
    %c0_23 = arith.constant 0 : index
    %c0_24 = arith.constant 0 : index
    %62 = vector.load %arg9[%c0_23, %c0_24] : memref<32x128xf32, #tpu.memory_space<vmem>>, vector<32x128xf32>
    tpu.vector_store %arg9[%c0_23, %c0_24], %61 {strides = array<i32>} : memref<32x128xf32, #tpu.memory_space<vmem>>, vector<32x128xf32>,
    return
  }
  func.func @transform_0(%arg0: i32) -> (i32, i32) {
    %c0_i32 = arith.constant 0 : i32
    %c0_i32_0 = arith.constant 0 : i32
    return %arg0, %c0_i32 : i32, i32
  }
  func.func @transform_1(%arg0: i32) -> (i32, i32) {
    %c0_i32 = arith.constant 0 : i32
    %c0_i32_0 = arith.constant 0 : i32
    %c0_i32_1 = arith.constant 0 : i32
    return %c0_i32, %c0_i32_0 : i32, i32
  }
  func.func @transform_2(%arg0: i32) -> (i32, i32) {
    %c0_i32 = arith.constant 0 : i32
    %c0_i32_0 = arith.constant 0 : i32
    %c0_i32_1 = arith.constant 0 : i32
    return %c0_i32, %c0_i32_0 : i32, i32
  }
  func.func @transform_3(%arg0: i32) -> (i32, i32) {
    %c0_i32 = arith.constant 0 : i32
    %c0_i32_0 = arith.constant 0 : i32
    %c0_i32_1 = arith.constant 0 : i32
    return %c0_i32, %c0_i32_0 : i32, i32
  }
  func.func @transform_4(%arg0: i32) -> (i32, i32) {
    %c0_i32 = arith.constant 0 : i32
    %c0_i32_0 = arith.constant 0 : i32
    %c0_i32_1 = arith.constant 0 : i32
    return %c0_i32, %c0_i32_0 : i32, i32
  }
  func.func @transform_5(%arg0: i32) -> (i32, i32) {
    %c0_i32 = arith.constant 0 : i32
    %c0_i32_0 = arith.constant 0 : i32
    %c0_i32_1 = arith.constant 0 : i32
    return %c0_i32, %c0_i32_0 : i32, i32
  }
  func.func @transform_6(%arg0: i32) -> (i32, i32) {
    %c0_i32 = arith.constant 0 : i32
    %c0_i32_0 = arith.constant 0 : i32
    %c0_i32_1 = arith.constant 0 : i32
    return %c0_i32, %c0_i32_0 : i32, i32
  }
  func.func @transform_7(%arg0: i32) -> (i32, i32, i32) {
    %c0_i32 = arith.constant 0 : i32
    %c0_i32_0 = arith.constant 0 : i32
    %c0_i32_1 = arith.constant 0 : i32
    %c0_i32_2 = arith.constant 0 : i32
    return %c0_i32, %c0_i32_0, %c0_i32_1 : i32, i32, i32
  }
  func.func @transform_8(%arg0: i32) -> (i32, i32) {
    %c0_i32 = arith.constant 0 : i32
    %c0_i32_0 = arith.constant 0 : i32
    return %arg0, %c0_i32 : i32, i32
  }
}

module attributes {stable_mosaic.version = 11 : i64} {
  func.func @_msa_kernel(%arg0: i32, %arg1: memref<32x32xf32, #tpu.memory_space<vmem>>, %arg2: memref<32x32xbf16, #tpu.memory_space<vmem>>, %arg3: memref<32x32xbf16, #tpu.memory_space<vmem>>, %arg4: memref<32x32xbf16, #tpu.memory_space<vmem>>, %arg5: memref<3x32xf32, #tpu.memory_space<vmem>>, %arg6: memref<32x128xbf16, #tpu.memory_space<vmem>>, %arg7: memref<1x128xf32, #tpu.memory_space<vmem>>, %arg8: memref<4x16x16xf32, #tpu.memory_space<vmem>>, %arg9: memref<32x128xf32, #tpu.memory_space<vmem>>) attributes {dimension_semantics = [#tpu.dimension_semantics<parallel>], iteration_bounds = array<i64: 4>, scalar_prefetch = 0 : i64, scratch_operands = 0 : i64, tpu.core_type = #tpu.core_type<tc>, window_params = [{transform_indices = @transform_0, window_bounds = array<i64: 32, 32>}, {pipeline_mode = #tpu.pipeline_mode<synchronous>, transform_indices = @transform_1, window_bounds = array<i64: 32, 32>}, {pipeline_mode = #tpu.pipeline_mode<synchronous>, transform_indices = @transform_2, window_bounds = array<i64: 32, 32>}, {pipeline_mode = #tpu.pipeline_mode<synchronous>, transform_indices = @transform_3, window_bounds = array<i64: 32, 32>}, {pipeline_mode = #tpu.pipeline_mode<synchronous>, transform_indices = @transform_4, window_bounds = array<i64: 3, 32>}, {pipeline_mode = #tpu.pipeline_mode<synchronous>, transform_indices = @transform_5, window_bounds = array<i64: 32, 128>}, {pipeline_mode = #tpu.pipeline_mode<synchronous>, transform_indices = @transform_6, window_bounds = array<i64: 1, 128>}, {pipeline_mode = #tpu.pipeline_mode<synchronous>, transform_indices = @transform_7, window_bounds = array<i64: 4, 16, 16>}, {transform_indices = @transform_8, window_bounds = array<i64: 32, 128>}]} {
    %c0 = arith.constant 0 : index
    %c0_0 = arith.constant 0 : index
    %0 = vector.load %arg1[%c0, %c0_0] : memref<32x32xf32, #tpu.memory_space<vmem>>, vector<32x32xf32>
    %1 = arith.truncf %0 : vector<32x32xf32> to vector<32x32xbf16>
    %c0_1 = arith.constant 0 : index
    %c0_2 = arith.constant 0 : index
    %2 = vector.load %arg5[%c0_1, %c0_2] : memref<3x32xf32, #tpu.memory_space<vmem>>, vector<3x32xf32>
    %c0_3 = arith.constant 0 : index
    %c0_4 = arith.constant 0 : index
    %3 = vector.load %arg2[%c0_3, %c0_4] : memref<32x32xbf16, #tpu.memory_space<vmem>>, vector<32x32xbf16>
    %cst = arith.constant dense<0.000000e+00> : vector<32x32xf32>
    %4 = tpu.matmul %1, %3, %cst {dimension_numbers = #tpu.dot_dimension_numbers<[1], [0], [0], [1], [0, 0, 1, 1], [], []>} : vector<32x32xbf16>, vector<32x32xbf16>, vector<32x32xf32> -> vector<32x32xf32>
    %5 = vector.extract_strided_slice %2 {offsets = [0, 0], sizes = [1, 32], strides = [1, 1]} : vector<3x32xf32> to vector<1x32xf32>
    %6 = vector.broadcast %5 : vector<1x32xf32> to vector<32x32xf32>
    %7 = arith.addf %4, %6 : vector<32x32xf32>
    %8 = vector.shape_cast %7 : vector<32x32xf32> to vector<2x16x32xf32>
    %9 = tpu.transpose %8, [0, 2, 1] : vector<2x16x32xf32> -> vector<2x32x16xf32>
    %10 = vector.shape_cast %9 : vector<2x32x16xf32> to vector<8x8x16xf32>
    %11 = tpu.transpose %10, [0, 2, 1] : vector<8x8x16xf32> -> vector<8x16x8xf32>
    %12 = arith.truncf %11 : vector<8x16x8xf32> to vector<8x16x8xbf16>
    %c0_5 = arith.constant 0 : index
    %c0_6 = arith.constant 0 : index
    %13 = vector.load %arg3[%c0_5, %c0_6] : memref<32x32xbf16, #tpu.memory_space<vmem>>, vector<32x32xbf16>
    %cst_7 = arith.constant dense<0.000000e+00> : vector<32x32xf32>
    %14 = tpu.matmul %1, %13, %cst_7 {dimension_numbers = #tpu.dot_dimension_numbers<[1], [0], [0], [1], [0, 0, 1, 1], [], []>} : vector<32x32xbf16>, vector<32x32xbf16>, vector<32x32xf32> -> vector<32x32xf32>
    %15 = vector.extract_strided_slice %2 {offsets = [1, 0], sizes = [1, 32], strides = [1, 1]} : vector<3x32xf32> to vector<1x32xf32>
    %16 = vector.broadcast %15 : vector<1x32xf32> to vector<32x32xf32>
    %17 = arith.addf %14, %16 : vector<32x32xf32>
    %18 = vector.shape_cast %17 : vector<32x32xf32> to vector<2x16x32xf32>
    %19 = tpu.transpose %18, [0, 2, 1] : vector<2x16x32xf32> -> vector<2x32x16xf32>
    %20 = vector.shape_cast %19 : vector<2x32x16xf32> to vector<8x8x16xf32>
    %21 = tpu.transpose %20, [0, 2, 1] : vector<8x8x16xf32> -> vector<8x16x8xf32>
    %22 = arith.truncf %21 : vector<8x16x8xf32> to vector<8x16x8xbf16>
    %c0_8 = arith.constant 0 : index
    %c0_9 = arith.constant 0 : index
    %23 = vector.load %arg4[%c0_8, %c0_9] : memref<32x32xbf16, #tpu.memory_space<vmem>>, vector<32x32xbf16>
    %cst_10 = arith.constant dense<0.000000e+00> : vector<32x32xf32>
    %24 = tpu.matmul %1, %23, %cst_10 {dimension_numbers = #tpu.dot_dimension_numbers<[1], [0], [0], [1], [0, 0, 1, 1], [], []>} : vector<32x32xbf16>, vector<32x32xbf16>, vector<32x32xf32> -> vector<32x32xf32>
    %25 = vector.extract_strided_slice %2 {offsets = [2, 0], sizes = [1, 32], strides = [1, 1]} : vector<3x32xf32> to vector<1x32xf32>
    %26 = vector.broadcast %25 : vector<1x32xf32> to vector<32x32xf32>
    %27 = arith.addf %24, %26 : vector<32x32xf32>
    %28 = vector.shape_cast %27 : vector<32x32xf32> to vector<2x16x32xf32>
    %29 = tpu.transpose %28, [0, 2, 1] : vector<2x16x32xf32> -> vector<2x32x16xf32>
    %30 = vector.shape_cast %29 : vector<2x32x16xf32> to vector<8x8x16xf32>
    %31 = tpu.transpose %30, [0, 2, 1] : vector<8x8x16xf32> -> vector<8x16x8xf32>
    %32 = arith.truncf %31 : vector<8x16x8xf32> to vector<8x16x8xbf16>
    "tpu.trace_start"() <{level = 10 : i32, message = "bpd,bqd->bpq"}> : () -> ()
    %cst_11 = arith.constant dense<0.000000e+00> : vector<8x16x16xf32>
    %33 = tpu.matmul %12, %22, %cst_11 {dimension_numbers = #tpu.dot_dimension_numbers<[2], [2], [1], [1], [0, 0, 0, 1, 1, 1], [0], [0]>} : vector<8x16x8xbf16>, vector<8x16x8xbf16>, vector<8x16x16xf32> -> vector<8x16x16xf32>
    "tpu.trace_stop"() : () -> ()
    %34 = vector.shape_cast %33 : vector<8x16x16xf32> to vector<2x4x16x16xf32>
    %c0_12 = arith.constant 0 : index
    %c0_13 = arith.constant 0 : index
    %c0_14 = arith.constant 0 : index
    %35 = vector.load %arg8[%c0_12, %c0_13, %c0_14] : memref<4x16x16xf32, #tpu.memory_space<vmem>>, vector<4x16x16xf32>
    %36 = vector.shape_cast %35 : vector<4x16x16xf32> to vector<1x4x16x16xf32>
    %37 = vector.broadcast %36 : vector<1x4x16x16xf32> to vector<2x4x16x16xf32>
    %38 = arith.addf %34, %37 : vector<2x4x16x16xf32>
    %39 = vector.shape_cast %38 : vector<2x4x16x16xf32> to vector<8x16x16xf32>
    %cst_15 = arith.constant dense<0xFF800000> : vector<8x16xf32>
    %40 = vector.multi_reduction <maximumf>, %39, %cst_15 [2] : vector<8x16x16xf32> to vector<8x16xf32>
    %41 = vector.shape_cast %40 : vector<8x16xf32> to vector<8x16x1xf32>
    %42 = vector.broadcast %41 : vector<8x16x1xf32> to vector<8x16x16xf32>
    %43 = arith.subf %39, %42 : vector<8x16x16xf32>
    %44 = math.exp %43 : vector<8x16x16xf32>
    %cst_16 = arith.constant dense<0.000000e+00> : vector<8x16xf32>
    %45 = vector.multi_reduction <add>, %44, %cst_16 [2] : vector<8x16x16xf32> to vector<8x16xf32>
    %46 = vector.shape_cast %45 : vector<8x16xf32> to vector<8x16x1xf32>
    %47 = tpu.reciprocal %46 {approx = true} : vector<8x16x1xf32> -> vector<8x16x1xf32>
    %48 = vector.broadcast %47 : vector<8x16x1xf32> to vector<8x16x16xf32>
    %49 = arith.mulf %44, %48 : vector<8x16x16xf32>
    %50 = arith.truncf %49 : vector<8x16x16xf32> to vector<8x16x16xbf16>
    "tpu.trace_start"() <{level = 10 : i32, message = "bpq,bqd->bpd"}> : () -> ()
    %cst_17 = arith.constant dense<0.000000e+00> : vector<8x16x8xf32>
    %51 = tpu.matmul %50, %32, %cst_17 {dimension_numbers = #tpu.dot_dimension_numbers<[2], [1], [1], [2], [0, 0, 0, 1, 1, 2], [0], [0]>} : vector<8x16x16xbf16>, vector<8x16x8xbf16>, vector<8x16x8xf32> -> vector<8x16x8xf32>
    "tpu.trace_stop"() : () -> ()
    %52 = tpu.transpose %51, [0, 2, 1] : vector<8x16x8xf32> -> vector<8x8x16xf32>
    %53 = vector.shape_cast %52 : vector<8x8x16xf32> to vector<2x32x16xf32>
    %54 = tpu.transpose %53, [0, 2, 1] : vector<2x32x16xf32> -> vector<2x16x32xf32>
    %55 = vector.shape_cast %54 : vector<2x16x32xf32> to vector<32x32xf32>
    %56 = arith.truncf %55 : vector<32x32xf32> to vector<32x32xbf16>
    %c0_18 = arith.constant 0 : index
    %c0_19 = arith.constant 0 : index
    %57 = vector.load %arg6[%c0_18, %c0_19] : memref<32x128xbf16, #tpu.memory_space<vmem>>, vector<32x128xbf16>
    %cst_20 = arith.constant dense<0.000000e+00> : vector<32x128xf32>
    %58 = tpu.matmul %56, %57, %cst_20 {dimension_numbers = #tpu.dot_dimension_numbers<[1], [0], [0], [1], [0, 0, 1, 1], [], []>} : vector<32x32xbf16>, vector<32x128xbf16>, vector<32x128xf32> -> vector<32x128xf32>
    %c0_21 = arith.constant 0 : index
    %c0_22 = arith.constant 0 : index
    %59 = vector.load %arg7[%c0_21, %c0_22] : memref<1x128xf32, #tpu.memory_space<vmem>>, vector<1x128xf32>
    %60 = vector.broadcast %59 : vector<1x128xf32> to vector<32x128xf32>
    %61 = arith.addf %58, %60 : vector<32x128xf32>
    %c0_23 = arith.constant 0 : index
    %c0_24 = arith.constant 0 : index
    %62 = vector.load %arg9[%c0_23, %c0_24] : memref<32x128xf32, #tpu.memory_space<vmem>>, vector<32x128xf32>
    tpu.vector_store %arg9[%c0_23, %c0_24], %61 {strides = array<i32>} : memref<32x128xf32, #tpu.memory_space<vmem>>, vector<32x128xf32>,
    return
  }
  func.func @transform_0(%arg0: i32) -> (i32, i32) {
    %c0_i32 = arith.constant 0 : i32
    %c0_i32_0 = arith.constant 0 : i32
    return %arg0, %c0_i32 : i32, i32
  }
  func.func @transform_1(%arg0: i32) -> (i32, i32) {
    %c0_i32 = arith.constant 0 : i32
    %c0_i32_0 = arith.constant 0 : i32
    %c0_i32_1 = arith.constant 0 : i32
    return %c0_i32, %c0_i32_0 : i32, i32
  }
  func.func @transform_2(%arg0: i32) -> (i32, i32) {
    %c0_i32 = arith.constant 0 : i32
    %c0_i32_0 = arith.constant 0 : i32
    %c0_i32_1 = arith.constant 0 : i32
    return %c0_i32, %c0_i32_0 : i32, i32
  }
  func.func @transform_3(%arg0: i32) -> (i32, i32) {
    %c0_i32 = arith.constant 0 : i32
    %c0_i32_0 = arith.constant 0 : i32
    %c0_i32_1 = arith.constant 0 : i32
    return %c0_i32, %c0_i32_0 : i32, i32
  }
  func.func @transform_4(%arg0: i32) -> (i32, i32) {
    %c0_i32 = arith.constant 0 : i32
    %c0_i32_0 = arith.constant 0 : i32
    %c0_i32_1 = arith.constant 0 : i32
    return %c0_i32, %c0_i32_0 : i32, i32
  }
  func.func @transform_5(%arg0: i32) -> (i32, i32) {
    %c0_i32 = arith.constant 0 : i32
    %c0_i32_0 = arith.constant 0 : i32
    %c0_i32_1 = arith.constant 0 : i32
    return %c0_i32, %c0_i32_0 : i32, i32
  }
  func.func @transform_6(%arg0: i32) -> (i32, i32) {
    %c0_i32 = arith.constant 0 : i32
    %c0_i32_0 = arith.constant 0 : i32
    %c0_i32_1 = arith.constant 0 : i32
    return %c0_i32, %c0_i32_0 : i32, i32
  }
  func.func @transform_7(%arg0: i32) -> (i32, i32, i32) {
    %c0_i32 = arith.constant 0 : i32
    %c0_i32_0 = arith.constant 0 : i32
    %c0_i32_1 = arith.constant 0 : i32
    %c0_i32_2 = arith.constant 0 : i32
    return %c0_i32, %c0_i32_0, %c0_i32_1 : i32, i32, i32
  }
  func.func @transform_8(%arg0: i32) -> (i32, i32) {
    %c0_i32 = arith.constant 0 : i32
    %c0_i32_0 = arith.constant 0 : i32
    return %arg0, %c0_i32 : i32, i32
  }
}

</mosaic_0001>

<bundles_post_ra>
// kernel: tpu_custom_call.1
= control target key start
LH: loop header
LB: loop body
LE: loop exit
PB: predicated region body
PF: predicated region fallthrough
CT: control target
= control target key end

     0   :  { %13 = vsyncpa [#allocation3], 0  ;;  %s4085_s0 = inlined_call_operand.vmem [shape: f32[128,32], index: 0, kind: input, shape index: {}]   ;;  %s4086_s1 = inlined_call_operand.vmem [shape: bf16[32,32], index: 1, kind: input, shape index: {}]   ;;  %s4087_s2 = inlined_call_operand.vmem [shape: bf16[32,32], index: 2, kind: input, shape index: {}]   ;;  %s4088_s3 = inlined_call_operand.vmem [shape: bf16[32,32], index: 3, kind: input, shape index: {}]   ;;  %s4089_s4 = inlined_call_operand.vmem [shape: f32[3,32], index: 4, kind: input, shape index: {}]   ;;  %s4090_s5 = inlined_call_operand.vmem [shape: bf16[32,128], index: 5, kind: input, shape index: {}]   ;;  %s4091_s6 = inlined_call_operand.vmem [shape: f32[1,128], index: 6, kind: input, shape index: {}]   ;;  %s4092_s7 = inlined_call_operand.vmem [shape: f32[4,16,16], index: 7, kind: input, shape index: {}]   ;;  %s4093_s8 = inlined_call_operand.hbm [shape: f32[128,128], index: 8, kind: output, shape index: {}]  }
   0x1   :  { %15 = vsyncpa [#allocation3 + $0x1], 0  ;;  %s3652_s27 = smov 0   ;;  %s3654_s28 = smov 0  }
   0x2   :  { %s3656_s29 = smov 0   ;;  %s3658_s30 = smov 0  }
   0x3 LB: > { %s3673_s9 = sadd.s32 4294967295, %s3600_s30   ;;  %s2931_s10 = sadd.s32 4294967294, %s3600_s30   ;;  %s3600_s30 = sphi %s3658_s30, %s4099_s30   ;;  %s3596_s29 = sphi %s3656_s29, %s4098_s29   ;;  %s3592_s28 = sphi %s3654_s28, %s4097_s28   ;;  %s3588_s27 = sphi %s3652_s27, %s4096_s27  }
   0x4   : > { %s3677_s11 = sadd.s32 1, %s3600_s30   ;;  %s201_s12 = sadd.s32 1, %s3596_s29 }
   0x5   : > { %s198_s13 = ssub.s32 %s3600_s30, %s3677_s11  ;;  %p211_p0 = scmp.ne.s32.totalorder %s3596_s29, %s3592_s28 }
   0x6   : > { %p199_p1 = scmp.eq.s32.totalorder %s198_s13, 0  ;;  %p212_p2 = scmp.eq.s32.totalorder %s3673_s9, 3 }
   0x7   : > { %p217_p3 = scmp.ne.s32.totalorder %s3592_s28, %s3588_s27  ;;  %p218_p4 = scmp.eq.s32.totalorder %s2931_s10, 3 }
   0x8   : > { %s3688_s14 = scalar_select %p199_p1, %s3596_s29, %s201_s12  }
   0x9   : > { %p3690_p5 = por %p212_p2, %p211_p0  ;;  %p3694_p6 = por %p218_p4, %p217_p3 }
   0xa   : > { %p2934_p7 = scmp.ge.s32.totalorder %s3600_s30, 1  ;;  %p266_p8 = scmp.lt.s32.totalorder %s3600_s30, 5 }
   0xc   : > { %p267_p9 = pnand %p2934_p7, %p266_p8 }
   0xd   : > { %v3466_v0 = vld [vmem:[%s4086_s1] sm:$0xff] (!%p267_p9)   ;;  %s2936_s19 = sshll.u32 (!%p267_p9), %s3673_s9, 2  ;;  %v3468_v2 = vld [vmem:[%s4086_s1 + $0x8] sm:$0xff] (!%p267_p9)   ;;  %vm335_vm0 = vcmask (!%p267_p9), 261120   ;;  %v319_v10 = vlaneseq (!%p267_p9)  ;;  %vm3603_vm1 = vmmov (!%p267_p9), 0   ;;  %vm1513_vm2 = vcmask (!%p267_p9), 64512  }
   0xe   : > { %270 = sbr.rel (%p267_p9) target bundleno = 1969 (0x7b1), region = 52  ;;  %v3467_v1 = vld [vmem:[%s4087_s2] sm:$0xff] (!%p267_p9)   ;;  %p301_p10 = scmp.lt.s32.totalorder (!%p267_p9), %s2936_s19, 15  ;;  %3025 = vmatprep.subr.bf16.mxu0 (!%p267_p9), %v3466_v0  ;;  %v3469_v3 = vld [vmem:[%s4087_s2 + $0x8] sm:$0xff] (!%p267_p9)   ;;  %vm1914_vm3 = vcmask (!%p267_p9), 130048  }
   0xf   : > { %3033 = vmatprep.subr.bf16.mxu1 (!%p267_p9), %v3467_v1  ;;  %3026 = vmatpush3.bf16.msra.mxu0 (!%p267_p9), %v3466_v0  ;;  %v3721_v11 = vshrl.u32 (!%p267_p9), %v319_v10, 7  ;;  %v3728_v14 = vld [vmem:[%s4089_s4] sm:$0x7] (!%p267_p9)  ;;  %v3471_v38 = vld [vmem:[%s4088_s3 + $0x8] sm:$0xff] (!%p267_p9)   ;;  %s297_s17 = sand.u32 (!%p267_p9), 1, %s3592_s28   ;;  %s2976_s23 = sshll.u32 (!%p267_p9), %s3673_s9, 9 }
  0x10   : > { %3034 = vmatpush3.bf16.msra.mxu1 (!%p267_p9), %v3467_v1  ;;  %3027 = vmatprep.subr.bf16.mxu0 (!%p267_p9), %v3468_v2  ;;  %v3470_v37 = vld [vmem:[%s4088_s3] sm:$0xff] (!%p267_p9)   ;;  %s2935_s18 = sshll.u32 (!%p267_p9), %s297_s17, 5  ;;  %s4044_s9 = scalar_lea.sflag (!%p267_p9), [#allocation3], %s297_s17 }
  0x11   : > { %3035 = vmatprep.subr.bf16.mxu1 (!%p267_p9), %v3469_v3  ;;  %v321_v12 = vsub.s32 (!%p267_p9), 0, %v3721_v11  ;;  %v725_v13 = vsub.s32 (!%p267_p9), 1, %v3721_v11  ;;  %s299_s21 = scalar_lea.vmem (!%p267_p9), [#allocation2], %s2935_s18  ;;  %s3604_s12 = smov (!%p267_p9), [#allocation2]  }
  0x12   : > { %s2869_s22 = sshll.u32 (!%p267_p9), %s299_s21, 4  ;;  %s4037_s22 = int_to_ptr.vmem [resolvable:$true] %s2869_s22 }
  0x13   : > { %3028 = vmatpush3.bf16.msra.mxu0 (!%p267_p9), %v3468_v2  ;;  %v322_v15 = vrot.slane (!%p267_p9), %v3728_v14, %v321_v12  ;;  %v726_v16 = vrot.slane (!%p267_p9), %v3728_v14, %v725_v13  ;;  %s3538_s10 = scalar_lea.vmem (!%p267_p9), %s4037_s22, 512 }
  0x14   : > { %3036 = vmatpush3.bf16.msra.mxu1 (!%p267_p9), %v3469_v3  ;;  %3041 = vmatprep.subr.bf16.mxu0 (!%p267_p9), %v3470_v37  ;;  %v3602_v3 = vmov (!%p267_p9), 0.0   ;;  %p3539_p11 = scmp.ne.s32.totalorder (!%p267_p9), %s4037_s22, %s3538_s10 }
  0x15   : > { %s4101_s19 = smov (!%p301_p10, %s2936_s19), 15  ;;  %3049 = vmatprep.subr.bf16.mxu1 %v3602_v3 }
  0x16   : > { %s2937_s26 = sshll.u32 %s4101_s19, 3  ;;  %p3540_p12 = pnand %p3539_p11, %p3690_p5 }
  0x17   : > { %s304_s13 = scalar_lea.vmem %s4085_s0, %s2937_s26  ;;  %s4042_s26 = scalar_lea.hbm %s4093_s8, %s2976_s23 }
  0x18   : > { %v308_v4 = vld [vmem:[%s304_s13] sm:$0xff]  ;;  %v309_v5 = vld [vmem:[%s304_s13 + $0x8] sm:$0xff]  ;;  %v310_v6 = vld [vmem:[%s304_s13 + $0x10] sm:$0xff]  ;;  %p3541_p13 = pneg %p3540_p12 }
  0x19   : > { %v312_v7 = vpack.c.bf16 %v309_v5, %v308_v4  ;;  %v311_v8 = vld [vmem:[%s304_s13 + $0x18] sm:$0xff]  ;;  %s3542_s13 = sshll.u32 %s3604_s12, 4  ;;  %s3543_s13 = int_to_ptr.vmem [resolvable:$false] %s3542_s13 }
  0x1a   : > { %v313_v9 = vpack.c.bf16 %v311_v8, %v310_v6  ;;  %v1122_v8 = vsub.s32 2, %v3721_v11  ;;  %s3544_s18 = scalar_lea.vmem %s3543_s13, 1024  ;;  %p3545_p0 = scmp.lt.s32.totalorder %s4037_s22, %s3543_s13 }
  0x1b   : > { %3029 = vmatprep.mubr.msk.bf16.mxu0 %vm335_vm0, %v312_v7  ;;  %3037 = vmatprep.mubr.msk.bf16.mxu1 %vm335_vm0, %v312_v7  ;;  %p3546_p1 = scmp.lt.s32.totalorder %s3544_s18, %s3538_s10 }
  0x1c   : > { %3030 = vmatmul.mubr.msk.bf16.vlgmr.msra.gmra.mrb[0].mxu0 %vm335_vm0, %v313_v9  ;;  %3038 = vmatmul.mubr.msk.bf16.vlgmr.msra.gmra.mrb[0].mxu1 %vm335_vm0, %v313_v9 }
  0x1d   : > { %3045 = vmatprep.mubr.msk.bf16.mxu0 %vm335_vm0, %v312_v7  ;;  %3042 = vmatpush3.bf16.msra.mxu0 %v3470_v37  ;;  %p3547_p2 = por %p3546_p1, %p3545_p0 }
  0x1e   : > { %3043 = vmatprep.subr.bf16.mxu0 %v3471_v38  ;;  %3051 = vmatprep.mubr.msk.bf16.mxu1 %vm3603_vm1, %v3602_v3 }
  0x1f   : > { %p3548_p3 = pnand %p3547_p2, %p3541_p13 }
  0x21   : > { %3044 = vmatpush3.bf16.msra.mxu0 %v3471_v38 }
  0x22   : > { %3055 = vmatprep.subr.bf16.mxu0 %v3602_v3 }
  0x24   : > { %3046 = vmatmul.mubr.msk.bf16.vlgmr.msra.gmra.mrb[4].mxu0 %vm335_vm0, %v313_v9  ;;  %v1123_v9 = vrot.slane %v3728_v14, %v1122_v8 }
  0x25   : > { %3057 = vmatprep.mubr.msk.bf16.mxu0 %vm3603_vm1, %v3602_v3 }
  0xef   : > { %v3031_v17 = vpop.f32.mrb[0].mxu0  ;;  %v3039_v18 = vpop.f32.mrb[0].mxu1 }
  0xf0   : > { %v385_v19 = vadd.f32 %v3031_v17, %v322_v15  ;;  %v782_v20 = vadd.f32 %v3039_v18, %v726_v16  ;;  %v376_v21 = vpop.f32.mrb[1].mxu0  ;;  %v773_v22 = vpop.f32.mrb[1].mxu1 }
  0xf1   : > { %v377_v23 = vadd.f32 %v376_v21, %v322_v15  ;;  %v774_v24 = vadd.f32 %v773_v22, %v726_v16  ;;  %v3032_v25 = vpop.f32.mrb[2].mxu0  ;;  %v3040_v26 = vpop.f32.mrb[2].mxu1 }
  0xf2   : > { %v388_v27 = vadd.f32 %v3032_v25, %v322_v15  ;;  %v785_v28 = vadd.f32 %v3040_v26, %v726_v16  ;;  %v379_v29 = vpop.f32.mrb[3].mxu0  ;;  %v776_v30 = vpop.f32.mrb[3].mxu1  ;;  %v3220_v31 = vpack.i.bf16 %v385_v19, %v782_v20 }
  0xf3   : > { %v380_v32 = vadd.f32 %v379_v29, %v322_v15  ;;  %v777_v33 = vadd.f32 %v776_v30, %v726_v16  ;;  %v3196_v34 = vpack.i.bf16 %v377_v23, %v774_v24 }
  0xf4   : > { %3221 = vxpose.xlu1.b32.start [1/2] (short) (narrow) %v3220_v31, 32  ;;  %v3222_v35 = vpack.i.bf16 %v388_v27, %v785_v28 }
  0xf5   : > { %3197 = vxpose.xlu0.b32.start [1/2] (short) (narrow) %v3196_v34, 32  ;;  %v3198_v36 = vpack.i.bf16 %v380_v32, %v777_v33 }
  0xf7   : > { %v3047_v10 = vpop.f32.mrb[4].mxu0 }
  0xf8   : > { %3223 = vxpose.xlu1.b32.end [2/2] (short) (narrow) %v3222_v35, 32  ;;  %v3747_v12 = vadd.f32 %v3047_v10, %v1123_v9  ;;  %v1170_v13 = vpop.f32.mrb[5].mxu0 }
  0xf9   : > { %3199 = vxpose.xlu0.b32.end [2/2] (short) (narrow) %v3198_v36, 32  ;;  %v3749_v15 = vadd.f32 %v1170_v13, %v1123_v9  ;;  %v3048_v16 = vpop.f32.mrb[6].mxu0 }
  0xfa   : > { %v3751_v17 = vadd.f32 %v3048_v16, %v1123_v9  ;;  %v1173_v18 = vpop.f32.mrb[7].mxu0 }
  0xfb   : > { %v3340_v19 = vpack.i.bf16 %v3747_v12, %v3749_v15  ;;  %v3755_v20 = vadd.f32 %v1173_v18, %v1123_v9 }
  0xfd   : > { %v3342_v11 = vpack.i.bf16 %v3751_v17, %v3755_v20 }
 0x174   : > { %v3224_v39 = vpop.trf.xlu1 }
 0x175   : > { %v3200_v40 = vpop.trf.xlu0  ;;  %v3225_v50 = vunpack.i.l.bf16 %v3224_v39  ;;  %v3228_v62 = vunpack.i.h.bf16 %v3224_v39 }
 0x176   : > { %v3201_v44 = vunpack.i.l.bf16 %v3200_v40  ;;  %v3204_v49 = vunpack.i.h.bf16 %v3200_v40 }
 0x178   : > { %v3229_v41 = vpop.trf.xlu1 }
 0x179   : > { %v3205_v42 = vpop.trf.xlu0  ;;  %v3230_v58 = vunpack.i.l.bf16 %v3229_v41  ;;  %v3233_v2 = vunpack.i.h.bf16 %v3229_v41 }
 0x17a   : > { %v3206_v43 = vunpack.i.l.bf16 %v3205_v42  ;;  %v3209_v56 = vunpack.i.h.bf16 %v3205_v42 }
 0x17c   : > { %v3244_v45 = vpack.i.bf16 %v3206_v43, %v3201_v44  ;;  %v3234_v46 = vpop.trf.xlu1 }
 0x17d   : > { %v3210_v47 = vpop.trf.xlu0  ;;  %v3235_v61 = vunpack.i.l.bf16 %v3234_v46  ;;  %v3238_v5 = vunpack.i.h.bf16 %v3234_v46 }
 0x17e   : > { %3245 = vxpose.xlu0.b32.start.end [1/1] (short) (narrow) %v3244_v45, 16  ;;  %v3211_v48 = vunpack.i.l.bf16 %v3210_v47  ;;  %v3214_v51 = vunpack.i.h.bf16 %v3210_v47 }
 0x17f   : > { %v3304_v0 = vpack.i.bf16 %v3235_v61, %v3228_v62 }
 0x180   : > { %v3256_v52 = vpack.i.bf16 %v3211_v48, %v3204_v49  ;;  %v3239_v53 = vpop.trf.xlu1  ;;  %v3280_v57 = vpack.i.bf16 %v3225_v50, %v3214_v51 }
 0x181   : > { %v3215_v54 = vpop.trf.xlu0  ;;  %v3240_v1 = vunpack.i.l.bf16 %v3239_v53  ;;  %v3243_v4 = vunpack.i.h.bf16 %v3239_v53 }
 0x182   : > { %3257 = vxpose.xlu1.b32.start.end [1/1] (short) (narrow) %v3256_v52, 16  ;;  %v3216_v55 = vunpack.i.l.bf16 %v3215_v54  ;;  %v3219_v59 = vunpack.i.h.bf16 %v3215_v54 }
 0x183   : > { %v3316_v6 = vpack.i.bf16 %v3240_v1, %v3233_v2  ;;  %v3328_v7 = vpack.i.bf16 %v3243_v4, %v3238_v5 }
 0x184   : > { %v3268_v60 = vpack.i.bf16 %v3216_v55, %v3209_v56  ;;  %v3292_v63 = vpack.i.bf16 %v3230_v58, %v3219_v59 }
 0x186   : > { %3269 = vxpose.xlu0.b32.start.end [1/1] (short) (narrow) %v3268_v60, 16 }
 0x187   : > { %3281 = vxpose.xlu1.b32.start.end [1/1] (short) (narrow) %v3280_v57, 16 }
 0x18b   : > { %3293 = vxpose.xlu0.b32.start.end [1/1] (short) (narrow) %v3292_v63, 16 }
 0x18c   : > { %3305 = vxpose.xlu1.b32.start.end [1/1] (short) (narrow) %v3304_v0, 16 }
 0x190   : > { %3317 = vxpose.xlu0.b32.start.end [1/1] (short) (narrow) %v3316_v6, 16 }
 0x191   : > { %3329 = vxpose.xlu1.b32.start.end [1/1] (short) (narrow) %v3328_v7, 16 }
 0x1fe   : > { %v3246_v21 = vpop.trf.xlu0 }
 0x1ff   : > { %v3250_v23 = vunpack.i.h.bf16 %v3246_v21  ;;  %v3247_v24 = vunpack.i.l.bf16 %v3246_v21 }
 0x202   : > { %v3258_v14 = vpop.trf.xlu1  ;;  %v3251_v22 = vpop.trf.xlu0 }
 0x203   : > { %v3255_v25 = vunpack.i.h.bf16 %v3251_v22  ;;  %v3252_v26 = vunpack.i.l.bf16 %v3251_v22  ;;  %v3262_v31 = vunpack.i.h.bf16 %v3258_v14  ;;  %v3259_v37 = vunpack.i.l.bf16 %v3258_v14 }
 0x205   : > { %v1108_v29 = vpack.c.bf16 %v3252_v26, %v3247_v24  ;;  %v1109_v30 = vpack.c.bf16 %v3255_v25, %v3250_v23 }
 0x206   : > { %v3263_v27 = vpop.trf.xlu1  ;;  %v3270_v28 = vpop.trf.xlu0 }
 0x207   : > { %v3267_v32 = vunpack.i.h.bf16 %v3263_v27  ;;  %v3274_v33 = vunpack.i.h.bf16 %v3270_v28  ;;  %v3271_v34 = vunpack.i.l.bf16 %v3270_v28  ;;  %v1518_v35 = vsel %vm1513_vm2, %v1108_v29, 0 }
 0x208   : > { %v1565_v36 = vsel %vm1513_vm2, %v1109_v30, 0  ;;  %v3264_v38 = vunpack.i.l.bf16 %v3263_v27  ;;  %3050 = vmatpush3.bf16.xpose.msra.mxu1 %v1518_v35  ;;  %v1890_v35 = vld [vmem:[%s4092_s7] sm:$0xff] }
 0x209   : > { %3056 = vmatpush3.bf16.xpose.msra.mxu0 %v1565_v36  ;;  %3061 = vmatprep.subr.bf16.mxu1 %v3602_v3  ;;  %v1110_v44 = vpack.c.bf16 %v3267_v32, %v3262_v31 }
 0x20a   : > { %v3275_v39 = vpop.trf.xlu0  ;;  %v3282_v40 = vpop.trf.xlu1  ;;  %3067 = vmatprep.subr.bf16.mxu0 %v3602_v3  ;;  %v711_v46 = vpack.c.bf16 %v3264_v38, %v3259_v37  ;;  %v1891_v38 = vld [vmem:[%s4092_s7 + $0x8] sm:$0xff] }
 0x20b   : > { %v3279_v41 = vunpack.i.h.bf16 %v3275_v39  ;;  %v3276_v42 = vunpack.i.l.bf16 %v3275_v39  ;;  %v3286_v49 = vunpack.i.h.bf16 %v3282_v40  ;;  %v3283_v51 = vunpack.i.l.bf16 %v3282_v40 }
 0x20c   : > { %v1612_v52 = vsel %vm1513_vm2, %v1110_v44, 0 }
 0x20d   : > { %v712_v43 = vpack.c.bf16 %v3276_v42, %v3271_v34  ;;  %v1111_v45 = vpack.c.bf16 %v3279_v41, %v3274_v33  ;;  %v1892_v42 = vld [vmem:[%s4092_s7 + $0x10] sm:$0xff] }
 0x20e   : > { %v3287_v47 = vpop.trf.xlu1  ;;  %v3294_v48 = vpop.trf.xlu0 }
 0x20f   : > { %v3291_v50 = vunpack.i.h.bf16 %v3287_v47  ;;  %3052 = vmatmul.mubr.msk.bf16.vlgmr.msra.gmra.mrb[4].mxu1 %vm1513_vm2, %v711_v46  ;;  %v3288_v53 = vunpack.i.l.bf16 %v3287_v47  ;;  %v1659_v54 = vsel %vm1513_vm2, %v1111_v45, 0  ;;  %v3298_v55 = vunpack.i.h.bf16 %v3294_v48 }
 0x210   : > { %3058 = vmatmul.mubr.msk.bf16.vlgmr.msra.gmra.mrb[8].mxu0 %vm1513_vm2, %v712_v43  ;;  %3062 = vmatpush3.bf16.xpose.msra.mxu1 %v1612_v52  ;;  %v3295_v56 = vunpack.i.l.bf16 %v3294_v48  ;;  %v1894_v52 = vld [vmem:[%s4092_s7 + $0x20] sm:$0xff] }
 0x211   : > { %3068 = vmatpush3.bf16.xpose.msra.mxu0 %v1659_v54  ;;  %3063 = vmatprep.mubr.msk.bf16.mxu1 %vm3603_vm1, %v3602_v3  ;;  %v1112_v59 = vpack.c.bf16 %v3291_v50, %v3286_v49  ;;  %v713_v62 = vpack.c.bf16 %v3288_v53, %v3283_v51  ;;  %v1893_v51 = vld [vmem:[%s4092_s7 + $0x18] sm:$0xff]  ;;  %v1896_v53 = vld [vmem:[%s4092_s7 + $0x30] sm:$0xff] }
 0x212   : > { %v3306_v57 = vpop.trf.xlu1  ;;  %v3299_v58 = vpop.trf.xlu0  ;;  %3073 = vmatprep.subr.bf16.mxu1 %v3602_v3  ;;  %3069 = vmatprep.mubr.msk.bf16.mxu0 %vm3603_vm1, %v3602_v3 }
 0x213   : > { %v3303_v60 = vunpack.i.h.bf16 %v3299_v58  ;;  %v3300_v61 = vunpack.i.l.bf16 %v3299_v58  ;;  %3079 = vmatprep.subr.bf16.mxu0 %v3602_v3  ;;  %v3310_v63 = vunpack.i.h.bf16 %v3306_v57  ;;  %v1706_v5 = vsel %vm1513_vm2, %v1112_v59, 0 }
 0x214   : > { %v3307_v7 = vunpack.i.l.bf16 %v3306_v57 }
 0x215   : > { %v714_v0 = vpack.c.bf16 %v3300_v61, %v3295_v56  ;;  %v1113_v4 = vpack.c.bf16 %v3303_v60, %v3298_v55  ;;  %v1895_v56 = vld [vmem:[%s4092_s7 + $0x28] sm:$0xff] }
 0x216   : > { %v3311_v1 = vpop.trf.xlu1  ;;  %v3318_v2 = vpop.trf.xlu0 }
 0x217   : > { %v3315_v6 = vunpack.i.h.bf16 %v3311_v1  ;;  %3064 = vmatmul.mubr.msk.bf16.vlgmr.msra.gmra.mrb[8].mxu1 %vm1513_vm2, %v713_v62  ;;  %v3312_v8 = vunpack.i.l.bf16 %v3311_v1  ;;  %v1753_v9 = vsel %vm1513_vm2, %v1113_v4, 0  ;;  %v3322_v10 = vunpack.i.h.bf16 %v3318_v2 }
 0x218   : > { %3070 = vmatmul.mubr.msk.bf16.vlgmr.msra.gmra.mrb[12].mxu0 %vm1513_vm2, %v714_v0  ;;  %3074 = vmatpush3.bf16.xpose.msra.mxu1 %v1706_v5  ;;  %v3319_v13 = vunpack.i.l.bf16 %v3318_v2 }
 0x219   : > { %3080 = vmatpush3.bf16.xpose.msra.mxu0 %v1753_v9  ;;  %3075 = vmatprep.mubr.msk.bf16.mxu1 %vm3603_vm1, %v3602_v3  ;;  %v1114_v21 = vpack.c.bf16 %v3315_v6, %v3310_v63  ;;  %v715_v23 = vpack.c.bf16 %v3312_v8, %v3307_v7  ;;  %v1897_v6 = vld [vmem:[%s4092_s7 + $0x38] sm:$0xff] }
 0x21a   : > { %v3330_v16 = vpop.trf.xlu1  ;;  %v3323_v18 = vpop.trf.xlu0  ;;  %3085 = vmatprep.subr.bf16.mxu1 %v3602_v3  ;;  %3081 = vmatprep.mubr.msk.bf16.mxu0 %vm3603_vm1, %v3602_v3 }
 0x21b   : > { %v3327_v14 = vunpack.i.h.bf16 %v3323_v18  ;;  %v3324_v22 = vunpack.i.l.bf16 %v3323_v18  ;;  %3091 = vmatprep.subr.bf16.mxu0 %v3602_v3  ;;  %v1800_v27 = vsel %vm1513_vm2, %v1114_v21, 0  ;;  %v3334_v29 = vunpack.i.h.bf16 %v3330_v16 }
 0x21c   : > { %v3331_v30 = vunpack.i.l.bf16 %v3330_v16 }
 0x21d   : > { %v716_v24 = vpack.c.bf16 %v3324_v22, %v3319_v13  ;;  %v1115_v26 = vpack.c.bf16 %v3327_v14, %v3322_v10 }
 0x21e   : > { %v3335_v25 = vpop.trf.xlu1 }
 0x21f   : > { %v1847_v28 = vsel %vm1513_vm2, %v1115_v26, 0  ;;  %3076 = vmatmul.mubr.msk.bf16.vlgmr.msra.gmra.mrb[12].mxu1 %vm1513_vm2, %v715_v23  ;;  %v3339_v31 = vunpack.i.h.bf16 %v3335_v25  ;;  %v3336_v32 = vunpack.i.l.bf16 %v3335_v25 }
 0x220   : > { %3082 = vmatmul.mubr.msk.bf16.vlgmr.msra.gmra.mrb[16].mxu0 %vm1513_vm2, %v716_v24  ;;  %3086 = vmatpush3.bf16.xpose.msra.mxu1 %v1800_v27 }
 0x221   : > { %3092 = vmatpush3.bf16.xpose.msra.mxu0 %v1847_v28  ;;  %3087 = vmatprep.mubr.msk.bf16.mxu1 %vm3603_vm1, %v3602_v3  ;;  %v717_v33 = vpack.c.bf16 %v3336_v32, %v3331_v30  ;;  %v718_v34 = vpack.c.bf16 %v3339_v31, %v3334_v29 }
 0x222   : > { %3093 = vmatprep.mubr.msk.bf16.mxu0 %vm3603_vm1, %v3602_v3  ;;  %3097 = vmatprep.subr.bf16.mxu1 %v3602_v3 }
 0x223   : > { %3103 = vmatprep.subr.bf16.mxu0 %v3602_v3 }
 0x227   : > { %3088 = vmatmul.mubr.msk.bf16.vlgmr.msra.gmra.mrb[16].mxu1 %vm1513_vm2, %v717_v33 }
 0x228   : > { %3094 = vmatmul.mubr.msk.bf16.vlgmr.msra.gmra.mrb[20].mxu0 %vm1513_vm2, %v718_v34  ;;  %3099 = vmatprep.mubr.msk.bf16.mxu1 %vm3603_vm1, %v3602_v3 }
 0x229   : > { %3105 = vmatprep.mubr.msk.bf16.mxu0 %vm3603_vm1, %v3602_v3 }
 0x2e2   : > { %v1554_v36 = vpop.f32.mrb[4].mxu1 }
 0x2e3   : > { %v1601_v37 = vpop.f32.mrb[8].mxu0  ;;  %v3805_v39 = vadd.f32 %v1890_v35, %v1554_v36  ;;  %v3053_v40 = vpop.f32.mrb[5].mxu1 }
 0x2e4   : > { %v3059_v41 = vpop.f32.mrb[9].mxu0  ;;  %v1557_v43 = vpop.f32.mrb[6].mxu1  ;;  %v3814_v49 = vadd.f32 %v1892_v42, %v1601_v37 }
 0x2e5   : > { %v1604_v44 = vpop.f32.mrb[10].mxu0  ;;  %v3810_v45 = vadd.f32 %v1891_v38, %v1557_v43  ;;  %v3054_v46 = vpop.f32.mrb[7].mxu1  ;;  %v1915_v48 = vsel %vm1914_vm3, %v3805_v39, -inf }
 0x2e6   : > { %v3060_v47 = vpop.f32.mrb[11].mxu0  ;;  %1916 = vmax.xlane.f32.xlu0 %v1915_v48  ;;  %v3830_v57 = vadd.f32 %v1893_v51, %v1604_v44  ;;  %v1921_v59 = vsel %vm1914_vm3, %v3814_v49, -inf }
 0x2e7   : > { %v1918_v50 = vsel %vm1914_vm3, %v3810_v45, -inf }
 0x2e8   : > { %1919 = vmax.xlane.f32.xlu1 %v1918_v50  ;;  %v1924_v7 = vsel %vm1914_vm3, %v3830_v57, -inf }
 0x2ea   : > { %v1648_v54 = vpop.f32.mrb[8].mxu1 }
 0x2eb   : > { %v1695_v55 = vpop.f32.mrb[12].mxu0  ;;  %v3832_v58 = vadd.f32 %v1894_v52, %v1648_v54  ;;  %v3065_v61 = vpop.f32.mrb[9].mxu1 }
 0x2ec   : > { %v3836_v60 = vadd.f32 %v1896_v53, %v1695_v55  ;;  %v3071_v62 = vpop.f32.mrb[13].mxu0  ;;  %1922 = vmax.xlane.f32.xlu1 %v1921_v59  ;;  %v1651_v63 = vpop.f32.mrb[10].mxu1 }
 0x2ed   : > { %v1698_v0 = vpop.f32.mrb[14].mxu0  ;;  %v1927_v1 = vsel %vm1914_vm3, %v3832_v58, -inf  ;;  %v3840_v2 = vadd.f32 %v1895_v56, %v1651_v63  ;;  %v3066_v4 = vpop.f32.mrb[11].mxu1 }
 0x2ee   : > { %v3072_v5 = vpop.f32.mrb[15].mxu0  ;;  %1928 = vmax.xlane.f32.xlu0 %v1927_v1  ;;  %v1933_v8 = vsel %vm1914_vm3, %v3836_v60, -inf  ;;  %v3849_v9 = vadd.f32 %v1897_v6, %v1698_v0 }
 0x2ef   : > { %v1930_v10 = vsel %vm1914_vm3, %v3840_v2, -inf }
 0x2f0   : > { %1925 = vmax.xlane.f32.xlu1 %v1924_v7  ;;  %v1936_v26 = vsel %vm1914_vm3, %v3849_v9, -inf }
 0x2f2   : > { %1934 = vmax.xlane.f32.xlu0 %v1933_v8  ;;  %v1742_v13 = vpop.f32.mrb[12].mxu1 }
 0x2f3   : > { %v1789_v16 = vpop.f32.mrb[16].mxu0  ;;  %v3853_v18 = vadd.f32 %v1890_v35, %v1742_v13  ;;  %v3077_v14 = vpop.f32.mrb[13].mxu1 }
 0x2f4   : > { %v3855_v21 = vadd.f32 %v1892_v42, %v1789_v16  ;;  %v3083_v22 = vpop.f32.mrb[17].mxu0  ;;  %1931 = vmax.xlane.f32.xlu1 %v1930_v10  ;;  %v1745_v23 = vpop.f32.mrb[14].mxu1 }
 0x2f5   : > { %v1792_v24 = vpop.f32.mrb[18].mxu0  ;;  %v1939_v25 = vsel %vm1914_vm3, %v3853_v18, -inf  ;;  %v3861_v27 = vadd.f32 %v1891_v38, %v1745_v23  ;;  %v3078_v28 = vpop.f32.mrb[15].mxu1 }
 0x2f6   : > { %v3084_v29 = vpop.f32.mrb[19].mxu0  ;;  %1940 = vmax.xlane.f32.xlu0 %v1939_v25  ;;  %v1945_v30 = vsel %vm1914_vm3, %v3855_v21, -inf  ;;  %v3865_v31 = vadd.f32 %v1893_v51, %v1792_v24 }
 0x2f7   : > { %v1942_v32 = vsel %vm1914_vm3, %v3861_v27, -inf }
 0x2f8   : > { %1937 = vmax.xlane.f32.xlu1 %v1936_v26  ;;  %v1948_v43 = vsel %vm1914_vm3, %v3865_v31, -inf }
 0x2fa   : > { %1946 = vmax.xlane.f32.xlu0 %v1945_v30  ;;  %v1836_v33 = vpop.f32.mrb[16].mxu1 }
 0x2fb   : > { %v1883_v34 = vpop.f32.mrb[20].mxu0  ;;  %v3869_v35 = vadd.f32 %v1894_v52, %v1836_v33  ;;  %v3089_v37 = vpop.f32.mrb[17].mxu1 }
 0x2fc   : > { %v3871_v36 = vadd.f32 %v1896_v53, %v1883_v34  ;;  %v3095_v38 = vpop.f32.mrb[21].mxu0  ;;  %1943 = vmax.xlane.f32.xlu1 %v1942_v32  ;;  %v1839_v40 = vpop.f32.mrb[18].mxu1 }
 0x2fd   : > { %v1886_v41 = vpop.f32.mrb[22].mxu0  ;;  %v1951_v42 = vsel %vm1914_vm3, %v3869_v35, -inf  ;;  %v3877_v44 = vadd.f32 %v1895_v56, %v1839_v40  ;;  %v3090_v46 = vpop.f32.mrb[19].mxu1 }
 0x2fe   : > { %v3096_v47 = vpop.f32.mrb[23].mxu0  ;;  %1952 = vmax.xlane.f32.xlu0 %v1951_v42  ;;  %v1957_v48 = vsel %vm1914_vm3, %v3871_v36, -inf  ;;  %v3881_v50 = vadd.f32 %v1897_v6, %v1886_v41 }
 0x2ff   : > { %v1954_v51 = vsel %vm1914_vm3, %v3877_v44, -inf }
 0x300   : > { %1949 = vmax.xlane.f32.xlu1 %v1948_v43  ;;  %v1960_v52 = vsel %vm1914_vm3, %v3881_v50, -inf }
 0x302   : > { %1958 = vmax.xlane.f32.xlu0 %v1957_v48 }
 0x304   : > { %1955 = vmax.xlane.f32.xlu1 %v1954_v51 }
 0x308   : > { %1961 = vmax.xlane.f32.xlu1 %v1960_v52 }
 0x373   : > { %v1917_v53 = vpop.xlane.xlu0 %1916 }
 0x374   : > { %v1963_v54 = vsub.f32 %v3805_v39, %v1917_v53 }
 0x375   : > { %v1920_v55 = vpop.xlane.xlu1 %1919 }
 0x376   : > { %v1979_v56 = vmul.f32 1.442695, %v1963_v54  ;;  %v1964_v59 = vsub.f32 %v3810_v45, %v1920_v55 }
 0x378   : > { %3474 = vpow2.f32 %v1979_v56  ;;  %v1981_v61 = vmul.f32 1.442695, %v1964_v59 }
 0x379   : > { %v1923_v62 = vpop.xlane.xlu1 %1922 }
 0x37a   : > { %3476 = vpow2.f32 %v1981_v61  ;;  %v1965_v63 = vsub.f32 %v3814_v49, %v1923_v62 }
 0x37b   : > { %v3890_v0 = vpop.xlane.xlu0 %1928 }
 0x37c   : > { %v1983_v1 = vmul.f32 1.442695, %v1965_v63 }
 0x37d   : > { %v1926_v4 = vpop.xlane.xlu1 %1925 }
 0x37e   : > { %3478 = vpow2.f32 %v1983_v1  ;;  %v1966_v5 = vsub.f32 %v3830_v57, %v1926_v4 }
 0x37f   : > { %v1935_v6 = vpop.xlane.xlu0 %1934 }
 0x380   : > { %v1985_v7 = vmul.f32 1.442695, %v1966_v5  ;;  %v1969_v39 = vsub.f32 %v3836_v60, %v1935_v6 }
 0x381   : > { %v1932_v8 = vpop.xlane.xlu1 %1931 }
 0x382   : > { %v3894_v10 = vpop.eup %3474  ;;  %3480 = vpow2.f32 %v1985_v7  ;;  %v1968_v45 = vsub.f32 %v3840_v2, %v1932_v8  ;;  %v1991_v16 = vmul.f32 1.442695, %v1969_v39 }
 0x383   : > { %v2011_v49 = vsel %vm1914_vm3, %v3894_v10, 0.0  ;;  %v1941_v22 = vpop.xlane.xlu0 %1940 }
 0x384   : > { %v3899_v13 = vpop.eup %3476  ;;  %v1989_v14 = vmul.f32 1.442695, %v1968_v45  ;;  %2012 = vadd.xlane.f32.xlu0 %v2011_v49  ;;  %v1971_v2 = vsub.f32 %v3853_v18, %v1941_v22 }
 0x385   : > { %v1938_v57 = vpop.xlane.xlu1 %1937  ;;  %v2014_v23 = vsel %vm1914_vm3, %v3899_v13, 0.0 }
 0x386   : > { %3482 = vpow2.f32 %v1989_v14  ;;  %v1970_v60 = vsub.f32 %v3849_v9, %v1938_v57  ;;  %2015 = vadd.xlane.f32.xlu1 %v2014_v23  ;;  %v1995_v30 = vmul.f32 1.442695, %v1971_v2  ;;  %v1967_v57 = vsub.f32 %v3832_v58, %v3890_v0 }
 0x387   : > { %3484 = vpow2.f32 %v1991_v16  ;;  %v1947_v33 = vpop.xlane.xlu0 %1946 }
 0x388   : > { %v3904_v24 = vpop.eup %3478  ;;  %v1993_v25 = vmul.f32 1.442695, %v1970_v60  ;;  %v1973_v18 = vsub.f32 %v3855_v21, %v1947_v33  ;;  %v1987_v23 = vmul.f32 1.442695, %v1967_v57 }
 0x389   : > { %v1944_v26 = vpop.xlane.xlu1 %1943  ;;  %v2017_v28 = vsel %vm1914_vm3, %v3904_v24, 0.0 }
 0x38a   : > { %2018 = vadd.xlane.f32.xlu0 %v2017_v28  ;;  %3486 = vpow2.f32 %v1993_v25  ;;  %v1972_v32 = vsub.f32 %v3861_v27, %v1944_v26  ;;  %v1999_v42 = vmul.f32 1.442695, %v1973_v18 }
 0x38b   : > { %3488 = vpow2.f32 %v1995_v30  ;;  %v1953_v43 = vpop.xlane.xlu0 %1952 }
 0x38c   : > { %v3909_v29 = vpop.eup %3480  ;;  %v1997_v37 = vmul.f32 1.442695, %v1972_v32  ;;  %v1975_v21 = vsub.f32 %v3869_v35, %v1953_v43 }
 0x38d   : > { %v2020_v9 = vsel %vm1914_vm3, %v3909_v29, 0.0  ;;  %v1950_v38 = vpop.xlane.xlu1 %1949 }
 0x38e   : > { %2021 = vadd.xlane.f32.xlu1 %v2020_v9  ;;  %3490 = vpow2.f32 %v1997_v37  ;;  %v1974_v27 = vsub.f32 %v3865_v31, %v1950_v38  ;;  %v2003_v54 = vmul.f32 1.442695, %v1975_v21 }
 0x38f   : > { %3492 = vpow2.f32 %v1999_v42  ;;  %v1959_v55 = vpop.xlane.xlu0 %1958 }
 0x390   : > { %v3914_v34 = vpop.eup %3482  ;;  %v2001_v48 = vmul.f32 1.442695, %v1974_v27  ;;  %v1977_v35 = vsub.f32 %v3871_v36, %v1959_v55 }
 0x391   : > { %v2026_v40 = vsel %vm1914_vm3, %v3914_v34, 0.0  ;;  %v3919_v41 = vpop.eup %3484  ;;  %v1956_v51 = vpop.xlane.xlu1 %1955 }
 0x392   : > { %2027 = vadd.xlane.f32.xlu1 %v2026_v40  ;;  %v2029_v46 = vsel %vm1914_vm3, %v3919_v41, 0.0  ;;  %3494 = vpow2.f32 %v2001_v48  ;;  %v1976_v31 = vsub.f32 %v3877_v44, %v1956_v51  ;;  %v2007_v4 = vmul.f32 1.442695, %v1977_v35 }
 0x393   : > { %3496 = vpow2.f32 %v2003_v54 }
 0x394   : > { %v3924_v47 = vpop.eup %3486  ;;  %v2005_v61 = vmul.f32 1.442695, %v1976_v31 }
 0x395   : > { %v2032_v52 = vsel %vm1914_vm3, %v3924_v47, 0.0  ;;  %v3929_v53 = vpop.eup %3488  ;;  %v1962_v62 = vpop.xlane.xlu1 %1961 }
 0x396   : > { %2030 = vadd.xlane.f32.xlu1 %v2029_v46  ;;  %v2035_v56 = vsel %vm1914_vm3, %v3929_v53, 0.0  ;;  %3498 = vpow2.f32 %v2005_v61  ;;  %v1978_v44 = vsub.f32 %v3881_v50, %v1962_v62 }
 0x397   : > { %3500 = vpow2.f32 %v2007_v4 }
 0x398   : > { %v3934_v59 = vpop.eup %3490  ;;  %v2009_v36 = vmul.f32 1.442695, %v1978_v44 }
 0x399   : > { %v2038_v63 = vsel %vm1914_vm3, %v3934_v59, 0.0  ;;  %v3939_v1 = vpop.eup %3492 }
 0x39a   : > { %2033 = vadd.xlane.f32.xlu1 %v2032_v52  ;;  %v2041_v5 = vsel %vm1914_vm3, %v3939_v1, 0.0  ;;  %3502 = vpow2.f32 %v2009_v36 }
 0x39b   : > { %3504 = vpow2.f32 %v1987_v23 }
 0x39c   : > { %v3944_v6 = vpop.eup %3494 }
 0x39d   : > { %v2044_v7 = vsel %vm1914_vm3, %v3944_v6, 0.0  ;;  %v3948_v39 = vpop.eup %3496 }
 0x39e   : > { %2036 = vadd.xlane.f32.xlu1 %v2035_v56  ;;  %v2047_v8 = vsel %vm1914_vm3, %v3948_v39, 0.0 }
 0x3a0   : > { %v3952_v45 = vpop.eup %3498 }
 0x3a1   : > { %v2050_v50 = vsel %vm1914_vm3, %v3952_v45, 0.0  ;;  %v3956_v49 = vpop.eup %3500 }
 0x3a2   : > { %2039 = vadd.xlane.f32.xlu1 %v2038_v63  ;;  %v2053_v16 = vsel %vm1914_vm3, %v3956_v49, 0.0 }
 0x3a4   : > { %v3960_v14 = vpop.eup %3502 }
 0x3a5   : > { %v2056_v22 = vsel %vm1914_vm3, %v3960_v14, 0.0  ;;  %v3972_v60 = vpop.eup %3504 }
 0x3a6   : > { %2042 = vadd.xlane.f32.xlu1 %v2041_v5  ;;  %v2023_v2 = vsel %vm1914_vm3, %v3972_v60, 0.0 }
 0x3aa   : > { %2045 = vadd.xlane.f32.xlu1 %v2044_v7 }
 0x3ae   : > { %2048 = vadd.xlane.f32.xlu1 %v2047_v8 }
 0x3b2   : > { %2051 = vadd.xlane.f32.xlu1 %v2050_v50 }
 0x3b6   : > { %2054 = vadd.xlane.f32.xlu1 %v2053_v16 }
 0x3b7   : > { %3341 = vxpose.xlu0.b32.start [1/2] (short) (narrow) %v3340_v19, 32 }
 0x3ba   : > { %2057 = vadd.xlane.f32.xlu1 %v2056_v22 }
 0x3bb   : > { %3343 = vxpose.xlu0.b32.end [2/2] (short) (narrow) %v3342_v11, 32 }
 0x3f0   : > { %2024 = vadd.xlane.f32.xlu0 %v2023_v2 }
 0x411   : > { %v2013_v12 = vpop.xlane.xlu0 %2012 }
 0x413   : > { %v2016_v40 = vpop.xlane.xlu1 %2015 }
 0x414   : > { %3506 = vrcp.f32 %v2016_v40 }
 0x417   : > { %v2019_v15 = vpop.xlane.xlu0 %2018 }
 0x41b   : > { %v2022_v42 = vpop.xlane.xlu1 %2021 }
 0x41c   : > { %3508 = vrcp.f32 %v2022_v42 }
 0x41d   : > { %3510 = vrcp.f32 %v2013_v12 }
 0x41e   : > { %3512 = vrcp.f32 %v2019_v15  ;;  %v3507_v62 = vpop.eup %3506 }
 0x41f   : > { %v2028_v27 = vpop.xlane.xlu1 %2027  ;;  %v2076_v16 = vmul.f32 %v3507_v62, %v3899_v13 }
 0x423   : > { %v2031_v43 = vpop.xlane.xlu1 %2030 }
 0x426   : > { %v3509_v63 = vpop.eup %3508 }
 0x427   : > { %v2034_v46 = vpop.xlane.xlu1 %2033  ;;  %v3511_v4 = vpop.eup %3510  ;;  %v2078_v22 = vmul.f32 %v3509_v63, %v3909_v29 }
 0x428   : > { %3514 = vrcp.f32 %v2034_v46  ;;  %v3513_v7 = vpop.eup %3512  ;;  %v2075_v2 = vmul.f32 %v3511_v4, %v3894_v10 }
 0x429   : > { %v2077_v12 = vmul.f32 %v3513_v7, %v3904_v24 }
 0x42b   : > { %v2037_v21 = vpop.xlane.xlu1 %2036 }
 0x42f   : > { %v2040_v48 = vpop.xlane.xlu1 %2039 }
 0x433   : > { %v2043_v51 = vpop.xlane.xlu1 %2042 }
 0x437   : > { %v3344_v19 = vpop.trf.xlu0  ;;  %v2046_v52 = vpop.xlane.xlu1 %2045 }
 0x438   : > { %v3345_v26 = vunpack.i.l.bf16 %v3344_v19  ;;  %v3348_v33 = vunpack.i.h.bf16 %v3344_v19  ;;  %v3515_v19 = vpop.eup %3514 }
 0x43b   : > { %v3349_v25 = vpop.trf.xlu0  ;;  %v3976_v54 = vpop.xlane.xlu1 %2048 }
 0x43c   : > { %v3350_v28 = vunpack.i.l.bf16 %v3349_v25  ;;  %v3353_v32 = vunpack.i.h.bf16 %v3349_v25  ;;  %v2091_v25 = vpack.c.bf16 %v2076_v16, %v2075_v2 }
 0x43e   : > { %v3364_v30 = vpack.i.bf16 %v3350_v28, %v3345_v26  ;;  %v3388_v9 = vpack.i.bf16 %v3353_v32, %v3348_v33  ;;  %v2092_v26 = vpack.c.bf16 %v2078_v22, %v2077_v12 }
 0x43f   : > { %v3354_v17 = vpop.trf.xlu0  ;;  %v2052_v31 = vpop.xlane.xlu1 %2051 }
 0x440   : > { %3365 = vxpose.xlu1.b32.start.end [1/1] (short) (narrow) %v3364_v30, 16  ;;  %v3355_v11 = vunpack.i.l.bf16 %v3354_v17  ;;  %v3358_v37 = vunpack.i.h.bf16 %v3354_v17 }
 0x443   : > { %v3359_v20 = vpop.trf.xlu0  ;;  %v3978_v55 = vpop.xlane.xlu1 %2054 }
 0x444   : > { %v3360_v58 = vunpack.i.l.bf16 %v3359_v20  ;;  %v3363_v18 = vunpack.i.h.bf16 %v3359_v20 }
 0x446   : > { %v3376_v0 = vpack.i.bf16 %v3360_v58, %v3355_v11  ;;  %v3400_v38 = vpack.i.bf16 %v3363_v18, %v3358_v37  ;;  %v2082_v11 = vmul.f32 %v3515_v19, %v3924_v47 }
 0x447   : > { %v2058_v56 = vpop.xlane.xlu1 %2057 }
 0x448   : > { %3377 = vxpose.xlu0.b32.start.end [1/1] (short) (narrow) %v3376_v0, 16 }
 0x44d   : > { %3389 = vxpose.xlu0.b32.start.end [1/1] (short) (narrow) %v3388_v9, 16 }
 0x452   : > { %3401 = vxpose.xlu0.b32.start.end [1/1] (short) (narrow) %v3400_v38, 16 }
 0x47d   : > { %v2025_v35 = vpop.xlane.xlu0 %2024 }
 0x47e   : > { %3516 = vrcp.f32 %v2025_v35 }
 0x47f   : > { %3518 = vrcp.f32 %v2028_v27 }
 0x480   : > { %3520 = vrcp.f32 %v2031_v43 }
 0x481   : > { %3522 = vrcp.f32 %v2040_v48 }
 0x482   : > { %3524 = vrcp.f32 %v2046_v52 }
 0x483   : > { %3526 = vrcp.f32 %v2037_v21 }
 0x484   : > { %3528 = vrcp.f32 %v2043_v51 }
 0x485   : > { %3530 = vrcp.f32 %v2052_v31 }
 0x486   : > { %3532 = vrcp.f32 %v2058_v56 }
 0x487   : > { %3534 = vrcp.f32 %v3976_v54 }
 0x488   : > { %v3517_v13 = vpop.eup %3516  ;;  %3536 = vrcp.f32 %v3978_v55 }
 0x489   : > { %v3519_v29 = vpop.eup %3518  ;;  %v2079_v58 = vmul.f32 %v3517_v13, %v3972_v60 }
 0x48a   : > { %v3521_v24 = vpop.eup %3520  ;;  %v2080_v33 = vmul.f32 %v3519_v29, %v3914_v34 }
 0x48b   : > { %v2081_v9 = vmul.f32 %v3521_v24, %v3919_v41  ;;  %v3523_v37 = vpop.eup %3522 }
 0x48c   : > { %v2093_v38 = vpack.c.bf16 %v2080_v33, %v2079_v58  ;;  %v3525_v47 = vpop.eup %3524  ;;  %v2084_v21 = vmul.f32 %v3523_v37, %v3934_v59 }
 0x48d   : > { %v2094_v40 = vpack.c.bf16 %v2082_v11, %v2081_v9  ;;  %v3527_v34 = vpop.eup %3526  ;;  %v2086_v48 = vmul.f32 %v3525_v47, %v3944_v6 }
 0x48e   : > { %v3529_v27 = vpop.eup %3528  ;;  %v2083_v54 = vmul.f32 %v3527_v34, %v3929_v53 }
 0x48f   : > { %v2085_v31 = vmul.f32 %v3529_v27, %v3939_v1  ;;  %v3531_v56 = vpop.eup %3530 }
 0x490   : > { %v2095_v35 = vpack.c.bf16 %v2084_v21, %v2083_v54  ;;  %v3533_v62 = vpop.eup %3532 }
 0x491   : > { %v3535_v6 = vpop.eup %3534 }
 0x492   : > { %v3537_v53 = vpop.eup %3536 }
 0x493   : > { %v2089_v16 = vmul.f32 %v3537_v53, %v3956_v49 }
 0x4c0   : > { %v3366_v61 = vpop.trf.xlu1 }
 0x4c1   : > { %v3370_v44 = vunpack.i.h.bf16 %v3366_v61  ;;  %v3367_v5 = vunpack.i.l.bf16 %v3366_v61  ;;  %v2096_v61 = vpack.c.bf16 %v2086_v48, %v2085_v31  ;;  %v3472_v31 = vld [vmem:[%s4090_s5] sm:$0xff]  }
 0x4c4   : > { %v3371_v36 = vpop.trf.xlu1 }
 0x4c5   : > { %v3375_v8 = vunpack.i.h.bf16 %v3371_v36  ;;  %v3372_v50 = vunpack.i.l.bf16 %v3371_v36  ;;  %v2090_v36 = vmul.f32 %v3533_v62, %v3960_v14 }
 0x4c7   : > { %v1505_v57 = vpack.c.bf16 %v3372_v50, %v3367_v5  ;;  %v1506_v23 = vpack.c.bf16 %v3375_v8, %v3370_v44  ;;  %v2088_v5 = vmul.f32 %v3531_v56, %v3952_v45  ;;  %v2087_v50 = vmul.f32 %v3535_v6, %v3948_v39 }
 0x4c8   : > { %v3378_v15 = vpop.trf.xlu0 }
 0x4c9   : > { %3098 = vmatpush3.bf16.msra.mxu1 %v1505_v57  ;;  %3104 = vmatpush3.bf16.msra.mxu0 %v1506_v23  ;;  %v3382_v28 = vunpack.i.h.bf16 %v3378_v15  ;;  %v3379_v10 = vunpack.i.l.bf16 %v3378_v15  ;;  %v2097_v22 = vpack.c.bf16 %v2088_v5, %v2087_v50  ;;  %v2098_v57 = vpack.c.bf16 %v2090_v36, %v2089_v16 }
 0x4ca   : > { %3109 = vmatprep.subr.bf16.mxu1 %v3602_v3  ;;  %3115 = vmatprep.subr.bf16.mxu0 %v3602_v3 }
 0x4cc   : > { %v3383_v30 = vpop.trf.xlu0  ;;  %3100 = vmatmul.mubr.msk.bf16.vlgmr.msra.gmra.mrb[20].mxu1 %vm1914_vm3, %v2091_v25  ;;  %3106 = vmatmul.mubr.msk.bf16.vlgmr.msra.gmra.mrb[24].mxu0 %vm1914_vm3, %v2092_v26 }
 0x4cd   : > { %v3387_v17 = vunpack.i.h.bf16 %v3383_v30  ;;  %v3384_v20 = vunpack.i.l.bf16 %v3383_v30  ;;  %3111 = vmatprep.mubr.msk.bf16.mxu1 %vm3603_vm1, %v3602_v3  ;;  %3117 = vmatprep.mubr.msk.bf16.mxu0 %vm3603_vm1, %v3602_v3 }
 0x4cf   : > { %v1507_v0 = vpack.c.bf16 %v3384_v20, %v3379_v10  ;;  %v1508_v32 = vpack.c.bf16 %v3387_v17, %v3382_v28 }
 0x4d0   : > { %v3390_v18 = vpop.trf.xlu0 }
 0x4d1   : > { %3110 = vmatpush3.bf16.msra.mxu1 %v1507_v0  ;;  %3116 = vmatpush3.bf16.msra.mxu0 %v1508_v32  ;;  %v3394_v60 = vunpack.i.h.bf16 %v3390_v18  ;;  %v3391_v41 = vunpack.i.l.bf16 %v3390_v18 }
 0x4d2   : > { %3121 = vmatprep.subr.bf16.mxu1 %v3602_v3  ;;  %3127 = vmatprep.subr.bf16.mxu0 %v3602_v3 }
 0x4d4   : > { %v3395_v42 = vpop.trf.xlu0  ;;  %3112 = vmatmul.mubr.msk.bf16.vlgmr.msra.gmra.mrb[24].mxu1 %vm1914_vm3, %v2093_v38  ;;  %3118 = vmatmul.mubr.msk.bf16.vlgmr.msra.gmra.mrb[28].mxu0 %vm1914_vm3, %v2094_v40 }
 0x4d5   : > { %v3399_v43 = vunpack.i.h.bf16 %v3395_v42  ;;  %v3396_v46 = vunpack.i.l.bf16 %v3395_v42  ;;  %3123 = vmatprep.mubr.msk.bf16.mxu1 %vm3603_vm1, %v3602_v3  ;;  %3129 = vmatprep.mubr.msk.bf16.mxu0 %vm3603_vm1, %v3602_v3 }
 0x4d7   : > { %v1509_v51 = vpack.c.bf16 %v3396_v46, %v3391_v41  ;;  %v1510_v52 = vpack.c.bf16 %v3399_v43, %v3394_v60 }
 0x4d8   : > { %v3402_v55 = vpop.trf.xlu0 }
 0x4d9   : > { %3122 = vmatpush3.bf16.msra.mxu1 %v1509_v51  ;;  %3128 = vmatpush3.bf16.msra.mxu0 %v1510_v52  ;;  %v3406_v59 = vunpack.i.h.bf16 %v3402_v55  ;;  %v3403_v63 = vunpack.i.l.bf16 %v3402_v55  ;;  %v3473_v55 = vld [vmem:[%s4090_s5 + $0x8] sm:$0xff]  }
 0x4da   : > { %3133 = vmatprep.subr.bf16.mxu1 %v3602_v3  ;;  %3139 = vmatprep.subr.bf16.mxu0 %v3602_v3 }
 0x4dc   : > { %v3407_v4 = vpop.trf.xlu0  ;;  %3124 = vmatmul.mubr.msk.bf16.vlgmr.msra.gmra.mrb[28].mxu1 %vm1914_vm3, %v2095_v35  ;;  %3130 = vmatmul.mubr.msk.bf16.vlgmr.msra.gmra.mrb[32].mxu0 %vm1914_vm3, %v2096_v61 }
 0x4dd   : > { %v3411_v1 = vunpack.i.h.bf16 %v3407_v4  ;;  %v3408_v44 = vunpack.i.l.bf16 %v3407_v4  ;;  %3135 = vmatprep.mubr.msk.bf16.mxu1 %vm3603_vm1, %v3602_v3  ;;  %3141 = vmatprep.mubr.msk.bf16.mxu0 %vm3603_vm1, %v3602_v3 }
 0x4df   : > { %v1511_v7 = vpack.c.bf16 %v3408_v44, %v3403_v63  ;;  %v1512_v8 = vpack.c.bf16 %v3411_v1, %v3406_v59  ;;  %v2966_v1 = vld [vmem:[%s4091_s6] ss:$0 sm:$0xff] }
 0x4e1   : > { %3134 = vmatpush3.bf16.msra.mxu1 %v1511_v7  ;;  %3140 = vmatpush3.bf16.msra.mxu0 %v1512_v8 }
 0x4e2   : > { %3145 = vmatprep.subr.bf16.mxu1 %v3472_v31 }
 0x4e4   : > { %3136 = vmatmul.mubr.msk.bf16.vlgmr.msra.gmra.mrb[32].mxu1 %vm1914_vm3, %v2097_v22  ;;  %3142 = vmatmul.mubr.msk.bf16.vlgmr.msra.gmra.mrb[36].mxu0 %vm1914_vm3, %v2098_v57 }
 0x4e5   : > { %3146 = vmatpush3.bf16.msra.mxu1 %v3472_v31 }
 0x4e6   : > { %3147 = vmatprep.subr.bf16.mxu1 %v3473_v55 }
 0x4e9   : > { %3148 = vmatpush3.bf16.msra.mxu1 %v3473_v55 }
 0x59f   : > { %v2136_v23 = vpop.f32.mrb[20].mxu1  ;;  %v2180_v3 = vpop.f32.mrb[24].mxu0 }
 0x5a0   : > { %v3101_v2 = vpop.f32.mrb[21].mxu1  ;;  %v3107_v45 = vpop.f32.mrb[25].mxu0 }
 0x5a1   : > { %v2139_v12 = vpop.f32.mrb[22].mxu1  ;;  %v2183_v14 = vpop.f32.mrb[26].mxu0 }
 0x5a2   : > { %v3102_v15 = vpop.f32.mrb[23].mxu1  ;;  %v3108_v19 = vpop.f32.mrb[27].mxu0 }
 0x5a7   : > { %v2224_v25 = vpop.f32.mrb[24].mxu1  ;;  %v2268_v39 = vpop.f32.mrb[28].mxu0 }
 0x5a8   : > { %v3113_v26 = vpop.f32.mrb[25].mxu1  ;;  %v3119_v49 = vpop.f32.mrb[29].mxu0 }
 0x5a9   : > { %v2227_v13 = vpop.f32.mrb[26].mxu1  ;;  %v2271_v29 = vpop.f32.mrb[30].mxu0 }
 0x5aa   : > { %v3114_v28 = vpop.f32.mrb[27].mxu1  ;;  %v3120_v10 = vpop.f32.mrb[31].mxu0 }
 0x5af   : > { %v2312_v30 = vpop.f32.mrb[28].mxu1  ;;  %v2356_v24 = vpop.f32.mrb[32].mxu0 }
 0x5b0   : > { %v3412_v17 = vpack.i.bf16 %v2312_v30, %v2136_v23  ;;  %v3421_v20 = vpack.i.bf16 %v2356_v24, %v2180_v3  ;;  %v3125_v11 = vpop.f32.mrb[29].mxu1  ;;  %v3131_v58 = vpop.f32.mrb[33].mxu0 }
 0x5b1   : > { %v2315_v0 = vpop.f32.mrb[30].mxu1  ;;  %v2359_v32 = vpop.f32.mrb[34].mxu0 }
 0x5b2   : > { %v3414_v33 = vpack.i.bf16 %v2315_v0, %v2139_v12  ;;  %v3423_v9 = vpack.i.bf16 %v2359_v32, %v2183_v14  ;;  %v3132_v18 = vpop.f32.mrb[35].mxu0  ;;  %3413 = vxpose.xlu0.b32.start [1/2] (short) (narrow) %v3412_v17, 8  ;;  %v3126_v37 = vpop.f32.mrb[31].mxu1 }
 0x5b6   : > { %3415 = vxpose.xlu0.b32.end [2/2] (short) (narrow) %v3414_v33, 8 }
 0x5b7   : > { %v2400_v38 = vpop.f32.mrb[32].mxu1  ;;  %v2444_v40 = vpop.f32.mrb[36].mxu0 }
 0x5b8   : > { %v3430_v47 = vpack.i.bf16 %v2400_v38, %v2224_v25  ;;  %v3439_v34 = vpack.i.bf16 %v2444_v40, %v2268_v39  ;;  %v3137_v60 = vpop.f32.mrb[33].mxu1  ;;  %v3143_v41 = vpop.f32.mrb[37].mxu0 }
 0x5b9   : > { %v2403_v42 = vpop.f32.mrb[34].mxu1  ;;  %v2447_v27 = vpop.f32.mrb[38].mxu0 }
 0x5ba   : > { %v3432_v43 = vpack.i.bf16 %v2403_v42, %v2227_v13  ;;  %v3441_v46 = vpack.i.bf16 %v2447_v27, %v2271_v29  ;;  %v3144_v21 = vpop.f32.mrb[39].mxu0  ;;  %3422 = vxpose.xlu0.b32.start [1/2] (short) (narrow) %v3421_v20, 8  ;;  %v3138_v48 = vpop.f32.mrb[35].mxu1 }
 0x5be   : > { %3424 = vxpose.xlu0.b32.end [2/2] (short) (narrow) %v3423_v9, 8 }
 0x5c2   : > { %3431 = vxpose.xlu0.b32.start [1/2] (short) (narrow) %v3430_v47, 8 }
 0x5c6   : > { %3433 = vxpose.xlu0.b32.end [2/2] (short) (narrow) %v3432_v43, 8 }
 0x5ca   : > { %3440 = vxpose.xlu0.b32.start [1/2] (short) (narrow) %v3439_v34, 8 }
 0x5ce   : > { %3442 = vxpose.xlu0.b32.end [2/2] (short) (narrow) %v3441_v46, 8 }
 0x632   : > { %v3416_v51 = vpop.trf.xlu0 }
 0x633   : > { %3449 = vxpose.xlu1.b32.start [1/4] (short) (narrow) %v3416_v51, 16 }
 0x63a   : > { %v3425_v52 = vpop.trf.xlu0 }
 0x63b   : > { %3451 = vxpose.xlu1.b32.cont [2/4] (short) (narrow) %v3425_v52, 16 }
 0x642   : > { %v3434_v54 = vpop.trf.xlu0 }
 0x643   : > { %3453 = vxpose.xlu1.b32.cont [3/4] (short) (narrow) %v3434_v54, 16 }
 0x64a   : > { %v3443_v56 = vpop.trf.xlu0 }
 0x64b   : > { %3455 = vxpose.xlu1.b32.end [4/4] (short) (narrow) %v3443_v56, 16 }
 0x6bf   : > { %v3456_v35 = vpop.trf.xlu1 }
 0x6c0   : > { %v3460_v61 = vunpack.i.h.bf16 %v3456_v35  ;;  %v3457_v62 = vunpack.i.l.bf16 %v3456_v35 }
 0x6c3   : > { %v3461_v59 = vpop.trf.xlu1 }
 0x6c4   : > { %v3465_v63 = vunpack.i.h.bf16 %v3461_v59  ;;  %v3462_v6 = vunpack.i.l.bf16 %v3461_v59 }
 0x6c6   : > { %v2771_v4 = vpack.c.bf16 %v3462_v6, %v3457_v62  ;;  %v2772_v53 = vpack.c.bf16 %v3465_v63, %v3460_v61 }
 0x6c8   : > { %3149 = vmatprep.mubr.msk.bf16.mxu1 %vm335_vm0, %v2771_v4 }
 0x6c9   : > { %3150 = vmatmul.mubr.msk.bf16.vlgmr.msra.gmra.mrb[36].mxu1 %vm335_vm0, %v2772_v53 }
 0x79c   : > { %v3151_v44 = vpop.f32.mrb[36].mxu1 }
 0x79d   : > { %v2845_v5 = vadd.f32 %v3151_v44, %v2966_v1  ;;  %v2836_v36 = vpop.f32.mrb[37].mxu1 }
 0x79e   : > { %v2837_v7 = vadd.f32 %v2966_v1, %v2836_v36  ;;  %v3152_v8 = vpop.f32.mrb[38].mxu1 }
 0x79f   : > { %2853 = vst [vmem:[%s299_s21 + $0x10] sm:$0xff] %v2845_v5  ;;  %v2848_v50 = vadd.f32 %v3152_v8, %v2966_v1  ;;  %v2839_v16 = vpop.f32.mrb[39].mxu1 }
 0x7a0   : > { %2851 = vst [vmem:[%s299_s21] sm:$0xff] %v2837_v7  ;;  %v2840_v22 = vadd.f32 %v2966_v1, %v2839_v16 }
 0x7a1   : > { %2854 = vst [vmem:[%s299_s21 + $0x18] sm:$0xff] %v2848_v50 }
 0x7a2   : > { %2852 = vst [vmem:[%s299_s21 + $0x8] sm:$0xff] %v2840_v22 }
 0x7a3   : > { %3551 = shalt.err (!%p3548_p3)
}
 0x7a4   : > { %s3552_s17 = scalar_lea.hbm %s4042_s26, 512  ;;  %s3556_s21 = scalar_lea.hbm %s4093_s8, 2048 }
 0x7a5   : > { %p3553_p4 = scmp.ne.s32.totalorder %s4042_s26, %s3552_s17  ;;  %p3557_p9 = scmp.lt.u32.totalorder %s4042_s26, %s4093_s8 }
 0x7a6   : > { %p3558_p10 = scmp.lt.u32.totalorder %s3556_s21, %s3552_s17  ;;  %p3560_p12 = scmp.lt.u32.totalorder %s3552_s17, %s4042_s26 }
 0x7a7   : > { %p3554_p7 = pnand %p3553_p4, %p3690_p5 }
 0x7a8   : > { %p3559_p11 = por %p3558_p10, %p3557_p9 }
 0x7a9   : > { %p3555_p8 = pneg %p3554_p7 }
 0x7aa   : > { %p3561_p13 = por %p3560_p12, %p3559_p11 }
 0x7ac   : > { %p3562_p0 = pnand %p3561_p13, %p3555_p8 }
 0x7ae   : > { %3565 = shalt.err (!%p3562_p0)
}
 0x7af   : > { %s3605_s25 = smov 128   ;;  %s3606_s10 = smov 8  }
 0x7b0   : > { %3153 = dma.vmem_to_hbm [thread:$0]  (%p3690_p5), %s4037_s22, 512, %s4042_s26, %s4044_s9, %s3605_s25, %s3605_s25, %s3606_s10  }
 0x7b1 PF: > { %p3159_p1 = scmp.ge.s32.totalorder %s3600_s30, 2  ;;  %s2884_s12 = sand.u32 1, %s3588_s27  }
 0x7b2   : > { %s2885_s13 = scalar_lea.sflag [#allocation3], %s2884_s12 }
 0x7b3   : > { %p3156_p2 = pnand %p3159_p1, %p3694_p6 }
 0x7b5   : > { %3583 = dma.done.wait (!%p3156_p2), %s2885_s13, 512  }
 0x7b6   : > { %3585 = vsyncadd (!%p3156_p2), %s2885_s13, 4294966784  ;;  %p18_p3 = scmp.ge.s32.totalorder %s3677_s11, 6   ;;  %s4096_s27 = smov %s3592_s28 }
 0x7b7   : > { %s4097_s28 = smov %s3596_s29  ;;  %s4098_s29 = smov %s3688_s14 }
 0x7b8   : > { %s4099_s30 = smov %s3677_s11  ;;  %20 = sbr.rel (!%p18_p3) target bundleno = 3 (0x3), region = 87 }
 0x7bf   :  { %2890 = vsyncpa [#allocation3], 1 }
 0x7c0   :  { %2892 = vsyncpa [#allocation3 + $0x1], 1 }

// kernel: tpu_custom_call.1
= control target key start
LH: loop header
LB: loop body
LE: loop exit
PB: predicated region body
PF: predicated region fallthrough
CT: control target
= control target key end

     0   :  { %13 = vsyncpa [#allocation3], 0  ;;  %s4085_s0 = inlined_call_operand.vmem [shape: f32[128,32], index: 0, kind: input, shape index: {}]   ;;  %s4086_s1 = inlined_call_operand.vmem [shape: bf16[32,32], index: 1, kind: input, shape index: {}]   ;;  %s4087_s2 = inlined_call_operand.vmem [shape: bf16[32,32], index: 2, kind: input, shape index: {}]   ;;  %s4088_s3 = inlined_call_operand.vmem [shape: bf16[32,32], index: 3, kind: input, shape index: {}]   ;;  %s4089_s4 = inlined_call_operand.vmem [shape: f32[3,32], index: 4, kind: input, shape index: {}]   ;;  %s4090_s5 = inlined_call_operand.vmem [shape: bf16[32,128], index: 5, kind: input, shape index: {}]   ;;  %s4091_s6 = inlined_call_operand.vmem [shape: f32[1,128], index: 6, kind: input, shape index: {}]   ;;  %s4092_s7 = inlined_call_operand.vmem [shape: f32[4,16,16], index: 7, kind: input, shape index: {}]   ;;  %s4093_s8 = inlined_call_operand.hbm [shape: f32[128,128], index: 8, kind: output, shape index: {}]  }
   0x1   :  { %15 = vsyncpa [#allocation3 + $0x1], 0  ;;  %s3652_s27 = smov 0   ;;  %s3654_s28 = smov 0  }
   0x2   :  { %s3656_s29 = smov 0   ;;  %s3658_s30 = smov 0  }
   0x3 LB: > { %s3673_s9 = sadd.s32 4294967295, %s3600_s30   ;;  %s2931_s10 = sadd.s32 4294967294, %s3600_s30   ;;  %s3600_s30 = sphi %s3658_s30, %s4099_s30   ;;  %s3596_s29 = sphi %s3656_s29, %s4098_s29   ;;  %s3592_s28 = sphi %s3654_s28, %s4097_s28   ;;  %s3588_s27 = sphi %s3652_s27, %s4096_s27  }
   0x4   : > { %s3677_s11 = sadd.s32 1, %s3600_s30   ;;  %s201_s12 = sadd.s32 1, %s3596_s29 }
   0x5   : > { %s198_s13 = ssub.s32 %s3600_s30, %s3677_s11  ;;  %p211_p0 = scmp.ne.s32.totalorder %s3596_s29, %s3592_s28 }
   0x6   : > { %p199_p1 = scmp.eq.s32.totalorder %s198_s13, 0  ;;  %p212_p2 = scmp.eq.s32.totalorder %s3673_s9, 3 }
   0x7   : > { %p217_p3 = scmp.ne.s32.totalorder %s3592_s28, %s3588_s27  ;;  %p218_p4 = scmp.eq.s32.totalorder %s2931_s10, 3 }
   0x8   : > { %s3688_s14 = scalar_select %p199_p1, %s3596_s29, %s201_s12  }
   0x9   : > { %p3690_p5 = por %p212_p2, %p211_p0  ;;  %p3694_p6 = por %p218_p4, %p217_p3 }
   0xa   : > { %p2934_p7 = scmp.ge.s32.totalorder %s3600_s30, 1  ;;  %p266_p8 = scmp.lt.s32.totalorder %s3600_s30, 5 }
   0xc   : > { %p267_p9 = pnand %p2934_p7, %p266_p8 }
   0xd   : > { %v3466_v0 = vld [vmem:[%s4086_s1] sm:$0xff] (!%p267_p9)   ;;  %s2936_s19 = sshll.u32 (!%p267_p9), %s3673_s9, 2  ;;  %v3468_v2 = vld [vmem:[%s4086_s1 + $0x8] sm:$0xff] (!%p267_p9)   ;;  %vm335_vm0 = vcmask (!%p267_p9), 261120   ;;  %v319_v10 = vlaneseq (!%p267_p9)  ;;  %vm3603_vm1 = vmmov (!%p267_p9), 0   ;;  %vm1513_vm2 = vcmask (!%p267_p9), 64512  }
   0xe   : > { %270 = sbr.rel (%p267_p9) target bundleno = 1969 (0x7b1), region = 52  ;;  %v3467_v1 = vld [vmem:[%s4087_s2] sm:$0xff] (!%p267_p9)   ;;  %p301_p10 = scmp.lt.s32.totalorder (!%p267_p9), %s2936_s19, 15  ;;  %3025 = vmatprep.subr.bf16.mxu0 (!%p267_p9), %v3466_v0  ;;  %v3469_v3 = vld [vmem:[%s4087_s2 + $0x8] sm:$0xff] (!%p267_p9)   ;;  %vm1914_vm3 = vcmask (!%p267_p9), 130048  }
   0xf   : > { %3033 = vmatprep.subr.bf16.mxu1 (!%p267_p9), %v3467_v1  ;;  %3026 = vmatpush3.bf16.msra.mxu0 (!%p267_p9), %v3466_v0  ;;  %v3721_v11 = vshrl.u32 (!%p267_p9), %v319_v10, 7  ;;  %v3728_v14 = vld [vmem:[%s4089_s4] sm:$0x7] (!%p267_p9)  ;;  %v3471_v38 = vld [vmem:[%s4088_s3 + $0x8] sm:$0xff] (!%p267_p9)   ;;  %s297_s17 = sand.u32 (!%p267_p9), 1, %s3592_s28   ;;  %s2976_s23 = sshll.u32 (!%p267_p9), %s3673_s9, 9 }
  0x10   : > { %3034 = vmatpush3.bf16.msra.mxu1 (!%p267_p9), %v3467_v1  ;;  %3027 = vmatprep.subr.bf16.mxu0 (!%p267_p9), %v3468_v2  ;;  %v3470_v37 = vld [vmem:[%s4088_s3] sm:$0xff] (!%p267_p9)   ;;  %s2935_s18 = sshll.u32 (!%p267_p9), %s297_s17, 5  ;;  %s4044_s9 = scalar_lea.sflag (!%p267_p9), [#allocation3], %s297_s17 }
  0x11   : > { %3035 = vmatprep.subr.bf16.mxu1 (!%p267_p9), %v3469_v3  ;;  %v321_v12 = vsub.s32 (!%p267_p9), 0, %v3721_v11  ;;  %v725_v13 = vsub.s32 (!%p267_p9), 1, %v3721_v11  ;;  %s299_s21 = scalar_lea.vmem (!%p267_p9), [#allocation2], %s2935_s18  ;;  %s3604_s12 = smov (!%p267_p9), [#allocation2]  }
  0x12   : > { %s2869_s22 = sshll.u32 (!%p267_p9), %s299_s21, 4  ;;  %s4037_s22 = int_to_ptr.vmem [resolvable:$true] %s2869_s22 }
  0x13   : > { %3028 = vmatpush3.bf16.msra.mxu0 (!%p267_p9), %v3468_v2  ;;  %v322_v15 = vrot.slane (!%p267_p9), %v3728_v14, %v321_v12  ;;  %v726_v16 = vrot.slane (!%p267_p9), %v3728_v14, %v725_v13  ;;  %s3538_s10 = scalar_lea.vmem (!%p267_p9), %s4037_s22, 512 }
  0x14   : > { %3036 = vmatpush3.bf16.msra.mxu1 (!%p267_p9), %v3469_v3  ;;  %3041 = vmatprep.subr.bf16.mxu0 (!%p267_p9), %v3470_v37  ;;  %v3602_v3 = vmov (!%p267_p9), 0.0   ;;  %p3539_p11 = scmp.ne.s32.totalorder (!%p267_p9), %s4037_s22, %s3538_s10 }
  0x15   : > { %s4101_s19 = smov (!%p301_p10, %s2936_s19), 15  ;;  %3049 = vmatprep.subr.bf16.mxu1 %v3602_v3 }
  0x16   : > { %s2937_s26 = sshll.u32 %s4101_s19, 3  ;;  %p3540_p12 = pnand %p3539_p11, %p3690_p5 }
  0x17   : > { %s304_s13 = scalar_lea.vmem %s4085_s0, %s2937_s26  ;;  %s4042_s26 = scalar_lea.hbm %s4093_s8, %s2976_s23 }
  0x18   : > { %v308_v4 = vld [vmem:[%s304_s13] sm:$0xff]  ;;  %v309_v5 = vld [vmem:[%s304_s13 + $0x8] sm:$0xff]  ;;  %v310_v6 = vld [vmem:[%s304_s13 + $0x10] sm:$0xff]  ;;  %p3541_p13 = pneg %p3540_p12 }
  0x19   : > { %v312_v7 = vpack.c.bf16 %v309_v5, %v308_v4  ;;  %v311_v8 = vld [vmem:[%s304_s13 + $0x18] sm:$0xff]  ;;  %s3542_s13 = sshll.u32 %s3604_s12, 4  ;;  %s3543_s13 = int_to_ptr.vmem [resolvable:$false] %s3542_s13 }
  0x1a   : > { %v313_v9 = vpack.c.bf16 %v311_v8, %v310_v6  ;;  %v1122_v8 = vsub.s32 2, %v3721_v11  ;;  %s3544_s18 = scalar_lea.vmem %s3543_s13, 1024  ;;  %p3545_p0 = scmp.lt.s32.totalorder %s4037_s22, %s3543_s13 }
  0x1b   : > { %3029 = vmatprep.mubr.msk.bf16.mxu0 %vm335_vm0, %v312_v7  ;;  %3037 = vmatprep.mubr.msk.bf16.mxu1 %vm335_vm0, %v312_v7  ;;  %p3546_p1 = scmp.lt.s32.totalorder %s3544_s18, %s3538_s10 }
  0x1c   : > { %3030 = vmatmul.mubr.msk.bf16.vlgmr.msra.gmra.mrb[0].mxu0 %vm335_vm0, %v313_v9  ;;  %3038 = vmatmul.mubr.msk.bf16.vlgmr.msra.gmra.mrb[0].mxu1 %vm335_vm0, %v313_v9 }
  0x1d   : > { %3045 = vmatprep.mubr.msk.bf16.mxu0 %vm335_vm0, %v312_v7  ;;  %3042 = vmatpush3.bf16.msra.mxu0 %v3470_v37  ;;  %p3547_p2 = por %p3546_p1, %p3545_p0 }
  0x1e   : > { %3043 = vmatprep.subr.bf16.mxu0 %v3471_v38  ;;  %3051 = vmatprep.mubr.msk.bf16.mxu1 %vm3603_vm1, %v3602_v3 }
  0x1f   : > { %p3548_p3 = pnand %p3547_p2, %p3541_p13 }
  0x21   : > { %3044 = vmatpush3.bf16.msra.mxu0 %v3471_v38 }
  0x22   : > { %3055 = vmatprep.subr.bf16.mxu0 %v3602_v3 }
  0x24   : > { %3046 = vmatmul.mubr.msk.bf16.vlgmr.msra.gmra.mrb[4].mxu0 %vm335_vm0, %v313_v9  ;;  %v1123_v9 = vrot.slane %v3728_v14, %v1122_v8 }
  0x25   : > { %3057 = vmatprep.mubr.msk.bf16.mxu0 %vm3603_vm1, %v3602_v3 }
  0xef   : > { %v3031_v17 = vpop.f32.mrb[0].mxu0  ;;  %v3039_v18 = vpop.f32.mrb[0].mxu1 }
  0xf0   : > { %v385_v19 = vadd.f32 %v3031_v17, %v322_v15  ;;  %v782_v20 = vadd.f32 %v3039_v18, %v726_v16  ;;  %v376_v21 = vpop.f32.mrb[1].mxu0  ;;  %v773_v22 = vpop.f32.mrb[1].mxu1 }
  0xf1   : > { %v377_v23 = vadd.f32 %v376_v21, %v322_v15  ;;  %v774_v24 = vadd.f32 %v773_v22, %v726_v16  ;;  %v3032_v25 = vpop.f32.mrb[2].mxu0  ;;  %v3040_v26 = vpop.f32.mrb[2].mxu1 }
  0xf2   : > { %v388_v27 = vadd.f32 %v3032_v25, %v322_v15  ;;  %v785_v28 = vadd.f32 %v3040_v26, %v726_v16  ;;  %v379_v29 = vpop.f32.mrb[3].mxu0  ;;  %v776_v30 = vpop.f32.mrb[3].mxu1  ;;  %v3220_v31 = vpack.i.bf16 %v385_v19, %v782_v20 }
  0xf3   : > { %v380_v32 = vadd.f32 %v379_v29, %v322_v15  ;;  %v777_v33 = vadd.f32 %v776_v30, %v726_v16  ;;  %v3196_v34 = vpack.i.bf16 %v377_v23, %v774_v24 }
  0xf4   : > { %3221 = vxpose.xlu1.b32.start [1/2] (short) (narrow) %v3220_v31, 32  ;;  %v3222_v35 = vpack.i.bf16 %v388_v27, %v785_v28 }
  0xf5   : > { %3197 = vxpose.xlu0.b32.start [1/2] (short) (narrow) %v3196_v34, 32  ;;  %v3198_v36 = vpack.i.bf16 %v380_v32, %v777_v33 }
  0xf7   : > { %v3047_v10 = vpop.f32.mrb[4].mxu0 }
  0xf8   : > { %3223 = vxpose.xlu1.b32.end [2/2] (short) (narrow) %v3222_v35, 32  ;;  %v3747_v12 = vadd.f32 %v3047_v10, %v1123_v9  ;;  %v1170_v13 = vpop.f32.mrb[5].mxu0 }
  0xf9   : > { %3199 = vxpose.xlu0.b32.end [2/2] (short) (narrow) %v3198_v36, 32  ;;  %v3749_v15 = vadd.f32 %v1170_v13, %v1123_v9  ;;  %v3048_v16 = vpop.f32.mrb[6].mxu0 }
  0xfa   : > { %v3751_v17 = vadd.f32 %v3048_v16, %v1123_v9  ;;  %v1173_v18 = vpop.f32.mrb[7].mxu0 }
  0xfb   : > { %v3340_v19 = vpack.i.bf16 %v3747_v12, %v3749_v15  ;;  %v3755_v20 = vadd.f32 %v1173_v18, %v1123_v9 }
  0xfd   : > { %v3342_v11 = vpack.i.bf16 %v3751_v17, %v3755_v20 }
 0x174   : > { %v3224_v39 = vpop.trf.xlu1 }
 0x175   : > { %v3200_v40 = vpop.trf.xlu0  ;;  %v3225_v50 = vunpack.i.l.bf16 %v3224_v39  ;;  %v3228_v62 = vunpack.i.h.bf16 %v3224_v39 }
 0x176   : > { %v3201_v44 = vunpack.i.l.bf16 %v3200_v40  ;;  %v3204_v49 = vunpack.i.h.bf16 %v3200_v40 }
 0x178   : > { %v3229_v41 = vpop.trf.xlu1 }
 0x179   : > { %v3205_v42 = vpop.trf.xlu0  ;;  %v3230_v58 = vunpack.i.l.bf16 %v3229_v41  ;;  %v3233_v2 = vunpack.i.h.bf16 %v3229_v41 }
 0x17a   : > { %v3206_v43 = vunpack.i.l.bf16 %v3205_v42  ;;  %v3209_v56 = vunpack.i.h.bf16 %v3205_v42 }
 0x17c   : > { %v3244_v45 = vpack.i.bf16 %v3206_v43, %v3201_v44  ;;  %v3234_v46 = vpop.trf.xlu1 }
 0x17d   : > { %v3210_v47 = vpop.trf.xlu0  ;;  %v3235_v61 = vunpack.i.l.bf16 %v3234_v46  ;;  %v3238_v5 = vunpack.i.h.bf16 %v3234_v46 }
 0x17e   : > { %3245 = vxpose.xlu0.b32.start.end [1/1] (short) (narrow) %v3244_v45, 16  ;;  %v3211_v48 = vunpack.i.l.bf16 %v3210_v47  ;;  %v3214_v51 = vunpack.i.h.bf16 %v3210_v47 }
 0x17f   : > { %v3304_v0 = vpack.i.bf16 %v3235_v61, %v3228_v62 }
 0x180   : > { %v3256_v52 = vpack.i.bf16 %v3211_v48, %v3204_v49  ;;  %v3239_v53 = vpop.trf.xlu1  ;;  %v3280_v57 = vpack.i.bf16 %v3225_v50, %v3214_v51 }
 0x181   : > { %v3215_v54 = vpop.trf.xlu0  ;;  %v3240_v1 = vunpack.i.l.bf16 %v3239_v53  ;;  %v3243_v4 = vunpack.i.h.bf16 %v3239_v53 }
 0x182   : > { %3257 = vxpose.xlu1.b32.start.end [1/1] (short) (narrow) %v3256_v52, 16  ;;  %v3216_v55 = vunpack.i.l.bf16 %v3215_v54  ;;  %v3219_v59 = vunpack.i.h.bf16 %v3215_v54 }
 0x183   : > { %v3316_v6 = vpack.i.bf16 %v3240_v1, %v3233_v2  ;;  %v3328_v7 = vpack.i.bf16 %v3243_v4, %v3238_v5 }
 0x184   : > { %v3268_v60 = vpack.i.bf16 %v3216_v55, %v3209_v56  ;;  %v3292_v63 = vpack.i.bf16 %v3230_v58, %v3219_v59 }
 0x186   : > { %3269 = vxpose.xlu0.b32.start.end [1/1] (short) (narrow) %v3268_v60, 16 }
 0x187   : > { %3281 = vxpose.xlu1.b32.start.end [1/1] (short) (narrow) %v3280_v57, 16 }
 0x18b   : > { %3293 = vxpose.xlu0.b32.start.end [1/1] (short) (narrow) %v3292_v63, 16 }
 0x18c   : > { %3305 = vxpose.xlu1.b32.start.end [1/1] (short) (narrow) %v3304_v0, 16 }
 0x190   : > { %3317 = vxpose.xlu0.b32.start.end [1/1] (short) (narrow) %v3316_v6, 16 }
 0x191   : > { %3329 = vxpose.xlu1.b32.start.end [1/1] (short) (narrow) %v3328_v7, 16 }
 0x1fe   : > { %v3246_v21 = vpop.trf.xlu0 }
 0x1ff   : > { %v3250_v23 = vunpack.i.h.bf16 %v3246_v21  ;;  %v3247_v24 = vunpack.i.l.bf16 %v3246_v21 }
 0x202   : > { %v3258_v14 = vpop.trf.xlu1  ;;  %v3251_v22 = vpop.trf.xlu0 }
 0x203   : > { %v3255_v25 = vunpack.i.h.bf16 %v3251_v22  ;;  %v3252_v26 = vunpack.i.l.bf16 %v3251_v22  ;;  %v3262_v31 = vunpack.i.h.bf16 %v3258_v14  ;;  %v3259_v37 = vunpack.i.l.bf16 %v3258_v14 }
 0x205   : > { %v1108_v29 = vpack.c.bf16 %v3252_v26, %v3247_v24  ;;  %v1109_v30 = vpack.c.bf16 %v3255_v25, %v3250_v23 }
 0x206   : > { %v3263_v27 = vpop.trf.xlu1  ;;  %v3270_v28 = vpop.trf.xlu0 }
 0x207   : > { %v3267_v32 = vunpack.i.h.bf16 %v3263_v27  ;;  %v3274_v33 = vunpack.i.h.bf16 %v3270_v28  ;;  %v3271_v34 = vunpack.i.l.bf16 %v3270_v28  ;;  %v1518_v35 = vsel %vm1513_vm2, %v1108_v29, 0 }
 0x208   : > { %v1565_v36 = vsel %vm1513_vm2, %v1109_v30, 0  ;;  %v3264_v38 = vunpack.i.l.bf16 %v3263_v27  ;;  %3050 = vmatpush3.bf16.xpose.msra.mxu1 %v1518_v35  ;;  %v1890_v35 = vld [vmem:[%s4092_s7] sm:$0xff] }
 0x209   : > { %3056 = vmatpush3.bf16.xpose.msra.mxu0 %v1565_v36  ;;  %3061 = vmatprep.subr.bf16.mxu1 %v3602_v3  ;;  %v1110_v44 = vpack.c.bf16 %v3267_v32, %v3262_v31 }
 0x20a   : > { %v3275_v39 = vpop.trf.xlu0  ;;  %v3282_v40 = vpop.trf.xlu1  ;;  %3067 = vmatprep.subr.bf16.mxu0 %v3602_v3  ;;  %v711_v46 = vpack.c.bf16 %v3264_v38, %v3259_v37  ;;  %v1891_v38 = vld [vmem:[%s4092_s7 + $0x8] sm:$0xff] }
 0x20b   : > { %v3279_v41 = vunpack.i.h.bf16 %v3275_v39  ;;  %v3276_v42 = vunpack.i.l.bf16 %v3275_v39  ;;  %v3286_v49 = vunpack.i.h.bf16 %v3282_v40  ;;  %v3283_v51 = vunpack.i.l.bf16 %v3282_v40 }
 0x20c   : > { %v1612_v52 = vsel %vm1513_vm2, %v1110_v44, 0 }
 0x20d   : > { %v712_v43 = vpack.c.bf16 %v3276_v42, %v3271_v34  ;;  %v1111_v45 = vpack.c.bf16 %v3279_v41, %v3274_v33  ;;  %v1892_v42 = vld [vmem:[%s4092_s7 + $0x10] sm:$0xff] }
 0x20e   : > { %v3287_v47 = vpop.trf.xlu1  ;;  %v3294_v48 = vpop.trf.xlu0 }
 0x20f   : > { %v3291_v50 = vunpack.i.h.bf16 %v3287_v47  ;;  %3052 = vmatmul.mubr.msk.bf16.vlgmr.msra.gmra.mrb[4].mxu1 %vm1513_vm2, %v711_v46  ;;  %v3288_v53 = vunpack.i.l.bf16 %v3287_v47  ;;  %v1659_v54 = vsel %vm1513_vm2, %v1111_v45, 0  ;;  %v3298_v55 = vunpack.i.h.bf16 %v3294_v48 }
 0x210   : > { %3058 = vmatmul.mubr.msk.bf16.vlgmr.msra.gmra.mrb[8].mxu0 %vm1513_vm2, %v712_v43  ;;  %3062 = vmatpush3.bf16.xpose.msra.mxu1 %v1612_v52  ;;  %v3295_v56 = vunpack.i.l.bf16 %v3294_v48  ;;  %v1894_v52 = vld [vmem:[%s4092_s7 + $0x20] sm:$0xff] }
 0x211   : > { %3068 = vmatpush3.bf16.xpose.msra.mxu0 %v1659_v54  ;;  %3063 = vmatprep.mubr.msk.bf16.mxu1 %vm3603_vm1, %v3602_v3  ;;  %v1112_v59 = vpack.c.bf16 %v3291_v50, %v3286_v49  ;;  %v713_v62 = vpack.c.bf16 %v3288_v53, %v3283_v51  ;;  %v1893_v51 = vld [vmem:[%s4092_s7 + $0x18] sm:$0xff]  ;;  %v1896_v53 = vld [vmem:[%s4092_s7 + $0x30] sm:$0xff] }
 0x212   : > { %v3306_v57 = vpop.trf.xlu1  ;;  %v3299_v58 = vpop.trf.xlu0  ;;  %3073 = vmatprep.subr.bf16.mxu1 %v3602_v3  ;;  %3069 = vmatprep.mubr.msk.bf16.mxu0 %vm3603_vm1, %v3602_v3 }
 0x213   : > { %v3303_v60 = vunpack.i.h.bf16 %v3299_v58  ;;  %v3300_v61 = vunpack.i.l.bf16 %v3299_v58  ;;  %3079 = vmatprep.subr.bf16.mxu0 %v3602_v3  ;;  %v3310_v63 = vunpack.i.h.bf16 %v3306_v57  ;;  %v1706_v5 = vsel %vm1513_vm2, %v1112_v59, 0 }
 0x214   : > { %v3307_v7 = vunpack.i.l.bf16 %v3306_v57 }
 0x215   : > { %v714_v0 = vpack.c.bf16 %v3300_v61, %v3295_v56  ;;  %v1113_v4 = vpack.c.bf16 %v3303_v60, %v3298_v55  ;;  %v1895_v56 = vld [vmem:[%s4092_s7 + $0x28] sm:$0xff] }
 0x216   : > { %v3311_v1 = vpop.trf.xlu1  ;;  %v3318_v2 = vpop.trf.xlu0 }
 0x217   : > { %v3315_v6 = vunpack.i.h.bf16 %v3311_v1  ;;  %3064 = vmatmul.mubr.msk.bf16.vlgmr.msra.gmra.mrb[8].mxu1 %vm1513_vm2, %v713_v62  ;;  %v3312_v8 = vunpack.i.l.bf16 %v3311_v1  ;;  %v1753_v9 = vsel %vm1513_vm2, %v1113_v4, 0  ;;  %v3322_v10 = vunpack.i.h.bf16 %v3318_v2 }
 0x218   : > { %3070 = vmatmul.mubr.msk.bf16.vlgmr.msra.gmra.mrb[12].mxu0 %vm1513_vm2, %v714_v0  ;;  %3074 = vmatpush3.bf16.xpose.msra.mxu1 %v1706_v5  ;;  %v3319_v13 = vunpack.i.l.bf16 %v3318_v2 }
 0x219   : > { %3080 = vmatpush3.bf16.xpose.msra.mxu0 %v1753_v9  ;;  %3075 = vmatprep.mubr.msk.bf16.mxu1 %vm3603_vm1, %v3602_v3  ;;  %v1114_v21 = vpack.c.bf16 %v3315_v6, %v3310_v63  ;;  %v715_v23 = vpack.c.bf16 %v3312_v8, %v3307_v7  ;;  %v1897_v6 = vld [vmem:[%s4092_s7 + $0x38] sm:$0xff] }
 0x21a   : > { %v3330_v16 = vpop.trf.xlu1  ;;  %v3323_v18 = vpop.trf.xlu0  ;;  %3085 = vmatprep.subr.bf16.mxu1 %v3602_v3  ;;  %3081 = vmatprep.mubr.msk.bf16.mxu0 %vm3603_vm1, %v3602_v3 }
 0x21b   : > { %v3327_v14 = vunpack.i.h.bf16 %v3323_v18  ;;  %v3324_v22 = vunpack.i.l.bf16 %v3323_v18  ;;  %3091 = vmatprep.subr.bf16.mxu0 %v3602_v3  ;;  %v1800_v27 = vsel %vm1513_vm2, %v1114_v21, 0  ;;  %v3334_v29 = vunpack.i.h.bf16 %v3330_v16 }
 0x21c   : > { %v3331_v30 = vunpack.i.l.bf16 %v3330_v16 }
 0x21d   : > { %v716_v24 = vpack.c.bf16 %v3324_v22, %v3319_v13  ;;  %v1115_v26 = vpack.c.bf16 %v3327_v14, %v3322_v10 }
 0x21e   : > { %v3335_v25 = vpop.trf.xlu1 }
 0x21f   : > { %v1847_v28 = vsel %vm1513_vm2, %v1115_v26, 0  ;;  %3076 = vmatmul.mubr.msk.bf16.vlgmr.msra.gmra.mrb[12].mxu1 %vm1513_vm2, %v715_v23  ;;  %v3339_v31 = vunpack.i.h.bf16 %v3335_v25  ;;  %v3336_v32 = vunpack.i.l.bf16 %v3335_v25 }
 0x220   : > { %3082 = vmatmul.mubr.msk.bf16.vlgmr.msra.gmra.mrb[16].mxu0 %vm1513_vm2, %v716_v24  ;;  %3086 = vmatpush3.bf16.xpose.msra.mxu1 %v1800_v27 }
 0x221   : > { %3092 = vmatpush3.bf16.xpose.msra.mxu0 %v1847_v28  ;;  %3087 = vmatprep.mubr.msk.bf16.mxu1 %vm3603_vm1, %v3602_v3  ;;  %v717_v33 = vpack.c.bf16 %v3336_v32, %v3331_v30  ;;  %v718_v34 = vpack.c.bf16 %v3339_v31, %v3334_v29 }
 0x222   : > { %3093 = vmatprep.mubr.msk.bf16.mxu0 %vm3603_vm1, %v3602_v3  ;;  %3097 = vmatprep.subr.bf16.mxu1 %v3602_v3 }
 0x223   : > { %3103 = vmatprep.subr.bf16.mxu0 %v3602_v3 }
 0x227   : > { %3088 = vmatmul.mubr.msk.bf16.vlgmr.msra.gmra.mrb[16].mxu1 %vm1513_vm2, %v717_v33 }
 0x228   : > { %3094 = vmatmul.mubr.msk.bf16.vlgmr.msra.gmra.mrb[20].mxu0 %vm1513_vm2, %v718_v34  ;;  %3099 = vmatprep.mubr.msk.bf16.mxu1 %vm3603_vm1, %v3602_v3 }
 0x229   : > { %3105 = vmatprep.mubr.msk.bf16.mxu0 %vm3603_vm1, %v3602_v3 }
 0x2e2   : > { %v1554_v36 = vpop.f32.mrb[4].mxu1 }
 0x2e3   : > { %v1601_v37 = vpop.f32.mrb[8].mxu0  ;;  %v3805_v39 = vadd.f32 %v1890_v35, %v1554_v36  ;;  %v3053_v40 = vpop.f32.mrb[5].mxu1 }
 0x2e4   : > { %v3059_v41 = vpop.f32.mrb[9].mxu0  ;;  %v1557_v43 = vpop.f32.mrb[6].mxu1  ;;  %v3814_v49 = vadd.f32 %v1892_v42, %v1601_v37 }
 0x2e5   : > { %v1604_v44 = vpop.f32.mrb[10].mxu0  ;;  %v3810_v45 = vadd.f32 %v1891_v38, %v1557_v43  ;;  %v3054_v46 = vpop.f32.mrb[7].mxu1  ;;  %v1915_v48 = vsel %vm1914_vm3, %v3805_v39, -inf }
 0x2e6   : > { %v3060_v47 = vpop.f32.mrb[11].mxu0  ;;  %1916 = vmax.xlane.f32.xlu0 %v1915_v48  ;;  %v3830_v57 = vadd.f32 %v1893_v51, %v1604_v44  ;;  %v1921_v59 = vsel %vm1914_vm3, %v3814_v49, -inf }
 0x2e7   : > { %v1918_v50 = vsel %vm1914_vm3, %v3810_v45, -inf }
 0x2e8   : > { %1919 = vmax.xlane.f32.xlu1 %v1918_v50  ;;  %v1924_v7 = vsel %vm1914_vm3, %v3830_v57, -inf }
 0x2ea   : > { %v1648_v54 = vpop.f32.mrb[8].mxu1 }
 0x2eb   : > { %v1695_v55 = vpop.f32.mrb[12].mxu0  ;;  %v3832_v58 = vadd.f32 %v1894_v52, %v1648_v54  ;;  %v3065_v61 = vpop.f32.mrb[9].mxu1 }
 0x2ec   : > { %v3836_v60 = vadd.f32 %v1896_v53, %v1695_v55  ;;  %v3071_v62 = vpop.f32.mrb[13].mxu0  ;;  %1922 = vmax.xlane.f32.xlu1 %v1921_v59  ;;  %v1651_v63 = vpop.f32.mrb[10].mxu1 }
 0x2ed   : > { %v1698_v0 = vpop.f32.mrb[14].mxu0  ;;  %v1927_v1 = vsel %vm1914_vm3, %v3832_v58, -inf  ;;  %v3840_v2 = vadd.f32 %v1895_v56, %v1651_v63  ;;  %v3066_v4 = vpop.f32.mrb[11].mxu1 }
 0x2ee   : > { %v3072_v5 = vpop.f32.mrb[15].mxu0  ;;  %1928 = vmax.xlane.f32.xlu0 %v1927_v1  ;;  %v1933_v8 = vsel %vm1914_vm3, %v3836_v60, -inf  ;;  %v3849_v9 = vadd.f32 %v1897_v6, %v1698_v0 }
 0x2ef   : > { %v1930_v10 = vsel %vm1914_vm3, %v3840_v2, -inf }
 0x2f0   : > { %1925 = vmax.xlane.f32.xlu1 %v1924_v7  ;;  %v1936_v26 = vsel %vm1914_vm3, %v3849_v9, -inf }
 0x2f2   : > { %1934 = vmax.xlane.f32.xlu0 %v1933_v8  ;;  %v1742_v13 = vpop.f32.mrb[12].mxu1 }
 0x2f3   : > { %v1789_v16 = vpop.f32.mrb[16].mxu0  ;;  %v3853_v18 = vadd.f32 %v1890_v35, %v1742_v13  ;;  %v3077_v14 = vpop.f32.mrb[13].mxu1 }
 0x2f4   : > { %v3855_v21 = vadd.f32 %v1892_v42, %v1789_v16  ;;  %v3083_v22 = vpop.f32.mrb[17].mxu0  ;;  %1931 = vmax.xlane.f32.xlu1 %v1930_v10  ;;  %v1745_v23 = vpop.f32.mrb[14].mxu1 }
 0x2f5   : > { %v1792_v24 = vpop.f32.mrb[18].mxu0  ;;  %v1939_v25 = vsel %vm1914_vm3, %v3853_v18, -inf  ;;  %v3861_v27 = vadd.f32 %v1891_v38, %v1745_v23  ;;  %v3078_v28 = vpop.f32.mrb[15].mxu1 }
 0x2f6   : > { %v3084_v29 = vpop.f32.mrb[19].mxu0  ;;  %1940 = vmax.xlane.f32.xlu0 %v1939_v25  ;;  %v1945_v30 = vsel %vm1914_vm3, %v3855_v21, -inf  ;;  %v3865_v31 = vadd.f32 %v1893_v51, %v1792_v24 }
 0x2f7   : > { %v1942_v32 = vsel %vm1914_vm3, %v3861_v27, -inf }
 0x2f8   : > { %1937 = vmax.xlane.f32.xlu1 %v1936_v26  ;;  %v1948_v43 = vsel %vm1914_vm3, %v3865_v31, -inf }
 0x2fa   : > { %1946 = vmax.xlane.f32.xlu0 %v1945_v30  ;;  %v1836_v33 = vpop.f32.mrb[16].mxu1 }
 0x2fb   : > { %v1883_v34 = vpop.f32.mrb[20].mxu0  ;;  %v3869_v35 = vadd.f32 %v1894_v52, %v1836_v33  ;;  %v3089_v37 = vpop.f32.mrb[17].mxu1 }
 0x2fc   : > { %v3871_v36 = vadd.f32 %v1896_v53, %v1883_v34  ;;  %v3095_v38 = vpop.f32.mrb[21].mxu0  ;;  %1943 = vmax.xlane.f32.xlu1 %v1942_v32  ;;  %v1839_v40 = vpop.f32.mrb[18].mxu1 }
 0x2fd   : > { %v1886_v41 = vpop.f32.mrb[22].mxu0  ;;  %v1951_v42 = vsel %vm1914_vm3, %v3869_v35, -inf  ;;  %v3877_v44 = vadd.f32 %v1895_v56, %v1839_v40  ;;  %v3090_v46 = vpop.f32.mrb[19].mxu1 }
 0x2fe   : > { %v3096_v47 = vpop.f32.mrb[23].mxu0  ;;  %1952 = vmax.xlane.f32.xlu0 %v1951_v42  ;;  %v1957_v48 = vsel %vm1914_vm3, %v3871_v36, -inf  ;;  %v3881_v50 = vadd.f32 %v1897_v6, %v1886_v41 }
 0x2ff   : > { %v1954_v51 = vsel %vm1914_vm3, %v3877_v44, -inf }
 0x300   : > { %1949 = vmax.xlane.f32.xlu1 %v1948_v43  ;;  %v1960_v52 = vsel %vm1914_vm3, %v3881_v50, -inf }
 0x302   : > { %1958 = vmax.xlane.f32.xlu0 %v1957_v48 }
 0x304   : > { %1955 = vmax.xlane.f32.xlu1 %v1954_v51 }
 0x308   : > { %1961 = vmax.xlane.f32.xlu1 %v1960_v52 }
 0x373   : > { %v1917_v53 = vpop.xlane.xlu0 %1916 }
 0x374   : > { %v1963_v54 = vsub.f32 %v3805_v39, %v1917_v53 }
 0x375   : > { %v1920_v55 = vpop.xlane.xlu1 %1919 }
 0x376   : > { %v1979_v56 = vmul.f32 1.442695, %v1963_v54  ;;  %v1964_v59 = vsub.f32 %v3810_v45, %v1920_v55 }
 0x378   : > { %3474 = vpow2.f32 %v1979_v56  ;;  %v1981_v61 = vmul.f32 1.442695, %v1964_v59 }
 0x379   : > { %v1923_v62 = vpop.xlane.xlu1 %1922 }
 0x37a   : > { %3476 = vpow2.f32 %v1981_v61  ;;  %v1965_v63 = vsub.f32 %v3814_v49, %v1923_v62 }
 0x37b   : > { %v3890_v0 = vpop.xlane.xlu0 %1928 }
 0x37c   : > { %v1983_v1 = vmul.f32 1.442695, %v1965_v63 }
 0x37d   : > { %v1926_v4 = vpop.xlane.xlu1 %1925 }
 0x37e   : > { %3478 = vpow2.f32 %v1983_v1  ;;  %v1966_v5 = vsub.f32 %v3830_v57, %v1926_v4 }
 0x37f   : > { %v1935_v6 = vpop.xlane.xlu0 %1934 }
 0x380   : > { %v1985_v7 = vmul.f32 1.442695, %v1966_v5  ;;  %v1969_v39 = vsub.f32 %v3836_v60, %v1935_v6 }
 0x381   : > { %v1932_v8 = vpop.xlane.xlu1 %1931 }
 0x382   : > { %v3894_v10 = vpop.eup %3474  ;;  %3480 = vpow2.f32 %v1985_v7  ;;  %v1968_v45 = vsub.f32 %v3840_v2, %v1932_v8  ;;  %v1991_v16 = vmul.f32 1.442695, %v1969_v39 }
 0x383   : > { %v2011_v49 = vsel %vm1914_vm3, %v3894_v10, 0.0  ;;  %v1941_v22 = vpop.xlane.xlu0 %1940 }
 0x384   : > { %v3899_v13 = vpop.eup %3476  ;;  %v1989_v14 = vmul.f32 1.442695, %v1968_v45  ;;  %2012 = vadd.xlane.f32.xlu0 %v2011_v49  ;;  %v1971_v2 = vsub.f32 %v3853_v18, %v1941_v22 }
 0x385   : > { %v1938_v57 = vpop.xlane.xlu1 %1937  ;;  %v2014_v23 = vsel %vm1914_vm3, %v3899_v13, 0.0 }
 0x386   : > { %3482 = vpow2.f32 %v1989_v14  ;;  %v1970_v60 = vsub.f32 %v3849_v9, %v1938_v57  ;;  %2015 = vadd.xlane.f32.xlu1 %v2014_v23  ;;  %v1995_v30 = vmul.f32 1.442695, %v1971_v2  ;;  %v1967_v57 = vsub.f32 %v3832_v58, %v3890_v0 }
 0x387   : > { %3484 = vpow2.f32 %v1991_v16  ;;  %v1947_v33 = vpop.xlane.xlu0 %1946 }
 0x388   : > { %v3904_v24 = vpop.eup %3478  ;;  %v1993_v25 = vmul.f32 1.442695, %v1970_v60  ;;  %v1973_v18 = vsub.f32 %v3855_v21, %v1947_v33  ;;  %v1987_v23 = vmul.f32 1.442695, %v1967_v57 }
 0x389   : > { %v1944_v26 = vpop.xlane.xlu1 %1943  ;;  %v2017_v28 = vsel %vm1914_vm3, %v3904_v24, 0.0 }
 0x38a   : > { %2018 = vadd.xlane.f32.xlu0 %v2017_v28  ;;  %3486 = vpow2.f32 %v1993_v25  ;;  %v1972_v32 = vsub.f32 %v3861_v27, %v1944_v26  ;;  %v1999_v42 = vmul.f32 1.442695, %v1973_v18 }
 0x38b   : > { %3488 = vpow2.f32 %v1995_v30  ;;  %v1953_v43 = vpop.xlane.xlu0 %1952 }
 0x38c   : > { %v3909_v29 = vpop.eup %3480  ;;  %v1997_v37 = vmul.f32 1.442695, %v1972_v32  ;;  %v1975_v21 = vsub.f32 %v3869_v35, %v1953_v43 }
 0x38d   : > { %v2020_v9 = vsel %vm1914_vm3, %v3909_v29, 0.0  ;;  %v1950_v38 = vpop.xlane.xlu1 %1949 }
 0x38e   : > { %2021 = vadd.xlane.f32.xlu1 %v2020_v9  ;;  %3490 = vpow2.f32 %v1997_v37  ;;  %v1974_v27 = vsub.f32 %v3865_v31, %v1950_v38  ;;  %v2003_v54 = vmul.f32 1.442695, %v1975_v21 }
 0x38f   : > { %3492 = vpow2.f32 %v1999_v42  ;;  %v1959_v55 = vpop.xlane.xlu0 %1958 }
 0x390   : > { %v3914_v34 = vpop.eup %3482  ;;  %v2001_v48 = vmul.f32 1.442695, %v1974_v27  ;;  %v1977_v35 = vsub.f32 %v3871_v36, %v1959_v55 }
 0x391   : > { %v2026_v40 = vsel %vm1914_vm3, %v3914_v34, 0.0  ;;  %v3919_v41 = vpop.eup %3484  ;;  %v1956_v51 = vpop.xlane.xlu1 %1955 }
 0x392   : > { %2027 = vadd.xlane.f32.xlu1 %v2026_v40  ;;  %v2029_v46 = vsel %vm1914_vm3, %v3919_v41, 0.0  ;;  %3494 = vpow2.f32 %v2001_v48  ;;  %v1976_v31 = vsub.f32 %v3877_v44, %v1956_v51  ;;  %v2007_v4 = vmul.f32 1.442695, %v1977_v35 }
 0x393   : > { %3496 = vpow2.f32 %v2003_v54 }
 0x394   : > { %v3924_v47 = vpop.eup %3486  ;;  %v2005_v61 = vmul.f32 1.442695, %v1976_v31 }
 0x395   : > { %v2032_v52 = vsel %vm1914_vm3, %v3924_v47, 0.0  ;;  %v3929_v53 = vpop.eup %3488  ;;  %v1962_v62 = vpop.xlane.xlu1 %1961 }
 0x396   : > { %2030 = vadd.xlane.f32.xlu1 %v2029_v46  ;;  %v2035_v56 = vsel %vm1914_vm3, %v3929_v53, 0.0  ;;  %3498 = vpow2.f32 %v2005_v61  ;;  %v1978_v44 = vsub.f32 %v3881_v50, %v1962_v62 }
 0x397   : > { %3500 = vpow2.f32 %v2007_v4 }
 0x398   : > { %v3934_v59 = vpop.eup %3490  ;;  %v2009_v36 = vmul.f32 1.442695, %v1978_v44 }
 0x399   : > { %v2038_v63 = vsel %vm1914_vm3, %v3934_v59, 0.0  ;;  %v3939_v1 = vpop.eup %3492 }
 0x39a   : > { %2033 = vadd.xlane.f32.xlu1 %v2032_v52  ;;  %v2041_v5 = vsel %vm1914_vm3, %v3939_v1, 0.0  ;;  %3502 = vpow2.f32 %v2009_v36 }
 0x39b   : > { %3504 = vpow2.f32 %v1987_v23 }
 0x39c   : > { %v3944_v6 = vpop.eup %3494 }
 0x39d   : > { %v2044_v7 = vsel %vm1914_vm3, %v3944_v6, 0.0  ;;  %v3948_v39 = vpop.eup %3496 }
 0x39e   : > { %2036 = vadd.xlane.f32.xlu1 %v2035_v56  ;;  %v2047_v8 = vsel %vm1914_vm3, %v3948_v39, 0.0 }
 0x3a0   : > { %v3952_v45 = vpop.eup %3498 }
 0x3a1   : > { %v2050_v50 = vsel %vm1914_vm3, %v3952_v45, 0.0  ;;  %v3956_v49 = vpop.eup %3500 }
 0x3a2   : > { %2039 = vadd.xlane.f32.xlu1 %v2038_v63  ;;  %v2053_v16 = vsel %vm1914_vm3, %v3956_v49, 0.0 }
 0x3a4   : > { %v3960_v14 = vpop.eup %3502 }
 0x3a5   : > { %v2056_v22 = vsel %vm1914_vm3, %v3960_v14, 0.0  ;;  %v3972_v60 = vpop.eup %3504 }
 0x3a6   : > { %2042 = vadd.xlane.f32.xlu1 %v2041_v5  ;;  %v2023_v2 = vsel %vm1914_vm3, %v3972_v60, 0.0 }
 0x3aa   : > { %2045 = vadd.xlane.f32.xlu1 %v2044_v7 }
 0x3ae   : > { %2048 = vadd.xlane.f32.xlu1 %v2047_v8 }
 0x3b2   : > { %2051 = vadd.xlane.f32.xlu1 %v2050_v50 }
 0x3b6   : > { %2054 = vadd.xlane.f32.xlu1 %v2053_v16 }
 0x3b7   : > { %3341 = vxpose.xlu0.b32.start [1/2] (short) (narrow) %v3340_v19, 32 }
 0x3ba   : > { %2057 = vadd.xlane.f32.xlu1 %v2056_v22 }
 0x3bb   : > { %3343 = vxpose.xlu0.b32.end [2/2] (short) (narrow) %v3342_v11, 32 }
 0x3f0   : > { %2024 = vadd.xlane.f32.xlu0 %v2023_v2 }
 0x411   : > { %v2013_v12 = vpop.xlane.xlu0 %2012 }
 0x413   : > { %v2016_v40 = vpop.xlane.xlu1 %2015 }
 0x414   : > { %3506 = vrcp.f32 %v2016_v40 }
 0x417   : > { %v2019_v15 = vpop.xlane.xlu0 %2018 }
 0x41b   : > { %v2022_v42 = vpop.xlane.xlu1 %2021 }
 0x41c   : > { %3508 = vrcp.f32 %v2022_v42 }
 0x41d   : > { %3510 = vrcp.f32 %v2013_v12 }
 0x41e   : > { %3512 = vrcp.f32 %v2019_v15  ;;  %v3507_v62 = vpop.eup %3506 }
 0x41f   : > { %v2028_v27 = vpop.xlane.xlu1 %2027  ;;  %v2076_v16 = vmul.f32 %v3507_v62, %v3899_v13 }
 0x423   : > { %v2031_v43 = vpop.xlane.xlu1 %2030 }
 0x426   : > { %v3509_v63 = vpop.eup %3508 }
 0x427   : > { %v2034_v46 = vpop.xlane.xlu1 %2033  ;;  %v3511_v4 = vpop.eup %3510  ;;  %v2078_v22 = vmul.f32 %v3509_v63, %v3909_v29 }
 0x428   : > { %3514 = vrcp.f32 %v2034_v46  ;;  %v3513_v7 = vpop.eup %3512  ;;  %v2075_v2 = vmul.f32 %v3511_v4, %v3894_v10 }
 0x429   : > { %v2077_v12 = vmul.f32 %v3513_v7, %v3904_v24 }
 0x42b   : > { %v2037_v21 = vpop.xlane.xlu1 %2036 }
 0x42f   : > { %v2040_v48 = vpop.xlane.xlu1 %2039 }
 0x433   : > { %v2043_v51 = vpop.xlane.xlu1 %2042 }
 0x437   : > { %v3344_v19 = vpop.trf.xlu0  ;;  %v2046_v52 = vpop.xlane.xlu1 %2045 }
 0x438   : > { %v3345_v26 = vunpack.i.l.bf16 %v3344_v19  ;;  %v3348_v33 = vunpack.i.h.bf16 %v3344_v19  ;;  %v3515_v19 = vpop.eup %3514 }
 0x43b   : > { %v3349_v25 = vpop.trf.xlu0  ;;  %v3976_v54 = vpop.xlane.xlu1 %2048 }
 0x43c   : > { %v3350_v28 = vunpack.i.l.bf16 %v3349_v25  ;;  %v3353_v32 = vunpack.i.h.bf16 %v3349_v25  ;;  %v2091_v25 = vpack.c.bf16 %v2076_v16, %v2075_v2 }
 0x43e   : > { %v3364_v30 = vpack.i.bf16 %v3350_v28, %v3345_v26  ;;  %v3388_v9 = vpack.i.bf16 %v3353_v32, %v3348_v33  ;;  %v2092_v26 = vpack.c.bf16 %v2078_v22, %v2077_v12 }
 0x43f   : > { %v3354_v17 = vpop.trf.xlu0  ;;  %v2052_v31 = vpop.xlane.xlu1 %2051 }
 0x440   : > { %3365 = vxpose.xlu1.b32.start.end [1/1] (short) (narrow) %v3364_v30, 16  ;;  %v3355_v11 = vunpack.i.l.bf16 %v3354_v17  ;;  %v3358_v37 = vunpack.i.h.bf16 %v3354_v17 }
 0x443   : > { %v3359_v20 = vpop.trf.xlu0  ;;  %v3978_v55 = vpop.xlane.xlu1 %2054 }
 0x444   : > { %v3360_v58 = vunpack.i.l.bf16 %v3359_v20  ;;  %v3363_v18 = vunpack.i.h.bf16 %v3359_v20 }
 0x446   : > { %v3376_v0 = vpack.i.bf16 %v3360_v58, %v3355_v11  ;;  %v3400_v38 = vpack.i.bf16 %v3363_v18, %v3358_v37  ;;  %v2082_v11 = vmul.f32 %v3515_v19, %v3924_v47 }
 0x447   : > { %v2058_v56 = vpop.xlane.xlu1 %2057 }
 0x448   : > { %3377 = vxpose.xlu0.b32.start.end [1/1] (short) (narrow) %v3376_v0, 16 }
 0x44d   : > { %3389 = vxpose.xlu0.b32.start.end [1/1] (short) (narrow) %v3388_v9, 16 }
 0x452   : > { %3401 = vxpose.xlu0.b32.start.end [1/1] (short) (narrow) %v3400_v38, 16 }
 0x47d   : > { %v2025_v35 = vpop.xlane.xlu0 %2024 }
 0x47e   : > { %3516 = vrcp.f32 %v2025_v35 }
 0x47f   : > { %3518 = vrcp.f32 %v2028_v27 }
 0x480   : > { %3520 = vrcp.f32 %v2031_v43 }
 0x481   : > { %3522 = vrcp.f32 %v2040_v48 }
 0x482   : > { %3524 = vrcp.f32 %v2046_v52 }
 0x483   : > { %3526 = vrcp.f32 %v2037_v21 }
 0x484   : > { %3528 = vrcp.f32 %v2043_v51 }
 0x485   : > { %3530 = vrcp.f32 %v2052_v31 }
 0x486   : > { %3532 = vrcp.f32 %v2058_v56 }
 0x487   : > { %3534 = vrcp.f32 %v3976_v54 }
 0x488   : > { %v3517_v13 = vpop.eup %3516  ;;  %3536 = vrcp.f32 %v3978_v55 }
 0x489   : > { %v3519_v29 = vpop.eup %3518  ;;  %v2079_v58 = vmul.f32 %v3517_v13, %v3972_v60 }
 0x48a   : > { %v3521_v24 = vpop.eup %3520  ;;  %v2080_v33 = vmul.f32 %v3519_v29, %v3914_v34 }
 0x48b   : > { %v2081_v9 = vmul.f32 %v3521_v24, %v3919_v41  ;;  %v3523_v37 = vpop.eup %3522 }
 0x48c   : > { %v2093_v38 = vpack.c.bf16 %v2080_v33, %v2079_v58  ;;  %v3525_v47 = vpop.eup %3524  ;;  %v2084_v21 = vmul.f32 %v3523_v37, %v3934_v59 }
 0x48d   : > { %v2094_v40 = vpack.c.bf16 %v2082_v11, %v2081_v9  ;;  %v3527_v34 = vpop.eup %3526  ;;  %v2086_v48 = vmul.f32 %v3525_v47, %v3944_v6 }
 0x48e   : > { %v3529_v27 = vpop.eup %3528  ;;  %v2083_v54 = vmul.f32 %v3527_v34, %v3929_v53 }
 0x48f   : > { %v2085_v31 = vmul.f32 %v3529_v27, %v3939_v1  ;;  %v3531_v56 = vpop.eup %3530 }
 0x490   : > { %v2095_v35 = vpack.c.bf16 %v2084_v21, %v2083_v54  ;;  %v3533_v62 = vpop.eup %3532 }
 0x491   : > { %v3535_v6 = vpop.eup %3534 }
 0x492   : > { %v3537_v53 = vpop.eup %3536 }
 0x493   : > { %v2089_v16 = vmul.f32 %v3537_v53, %v3956_v49 }
 0x4c0   : > { %v3366_v61 = vpop.trf.xlu1 }
 0x4c1   : > { %v3370_v44 = vunpack.i.h.bf16 %v3366_v61  ;;  %v3367_v5 = vunpack.i.l.bf16 %v3366_v61  ;;  %v2096_v61 = vpack.c.bf16 %v2086_v48, %v2085_v31  ;;  %v3472_v31 = vld [vmem:[%s4090_s5] sm:$0xff]  }
 0x4c4   : > { %v3371_v36 = vpop.trf.xlu1 }
 0x4c5   : > { %v3375_v8 = vunpack.i.h.bf16 %v3371_v36  ;;  %v3372_v50 = vunpack.i.l.bf16 %v3371_v36  ;;  %v2090_v36 = vmul.f32 %v3533_v62, %v3960_v14 }
 0x4c7   : > { %v1505_v57 = vpack.c.bf16 %v3372_v50, %v3367_v5  ;;  %v1506_v23 = vpack.c.bf16 %v3375_v8, %v3370_v44  ;;  %v2088_v5 = vmul.f32 %v3531_v56, %v3952_v45  ;;  %v2087_v50 = vmul.f32 %v3535_v6, %v3948_v39 }
 0x4c8   : > { %v3378_v15 = vpop.trf.xlu0 }
 0x4c9   : > { %3098 = vmatpush3.bf16.msra.mxu1 %v1505_v57  ;;  %3104 = vmatpush3.bf16.msra.mxu0 %v1506_v23  ;;  %v3382_v28 = vunpack.i.h.bf16 %v3378_v15  ;;  %v3379_v10 = vunpack.i.l.bf16 %v3378_v15  ;;  %v2097_v22 = vpack.c.bf16 %v2088_v5, %v2087_v50  ;;  %v2098_v57 = vpack.c.bf16 %v2090_v36, %v2089_v16 }
 0x4ca   : > { %3109 = vmatprep.subr.bf16.mxu1 %v3602_v3  ;;  %3115 = vmatprep.subr.bf16.mxu0 %v3602_v3 }
 0x4cc   : > { %v3383_v30 = vpop.trf.xlu0  ;;  %3100 = vmatmul.mubr.msk.bf16.vlgmr.msra.gmra.mrb[20].mxu1 %vm1914_vm3, %v2091_v25  ;;  %3106 = vmatmul.mubr.msk.bf16.vlgmr.msra.gmra.mrb[24].mxu0 %vm1914_vm3, %v2092_v26 }
 0x4cd   : > { %v3387_v17 = vunpack.i.h.bf16 %v3383_v30  ;;  %v3384_v20 = vunpack.i.l.bf16 %v3383_v30  ;;  %3111 = vmatprep.mubr.msk.bf16.mxu1 %vm3603_vm1, %v3602_v3  ;;  %3117 = vmatprep.mubr.msk.bf16.mxu0 %vm3603_vm1, %v3602_v3 }
 0x4cf   : > { %v1507_v0 = vpack.c.bf16 %v3384_v20, %v3379_v10  ;;  %v1508_v32 = vpack.c.bf16 %v3387_v17, %v3382_v28 }
 0x4d0   : > { %v3390_v18 = vpop.trf.xlu0 }
 0x4d1   : > { %3110 = vmatpush3.bf16.msra.mxu1 %v1507_v0  ;;  %3116 = vmatpush3.bf16.msra.mxu0 %v1508_v32  ;;  %v3394_v60 = vunpack.i.h.bf16 %v3390_v18  ;;  %v3391_v41 = vunpack.i.l.bf16 %v3390_v18 }
 0x4d2   : > { %3121 = vmatprep.subr.bf16.mxu1 %v3602_v3  ;;  %3127 = vmatprep.subr.bf16.mxu0 %v3602_v3 }
 0x4d4   : > { %v3395_v42 = vpop.trf.xlu0  ;;  %3112 = vmatmul.mubr.msk.bf16.vlgmr.msra.gmra.mrb[24].mxu1 %vm1914_vm3, %v2093_v38  ;;  %3118 = vmatmul.mubr.msk.bf16.vlgmr.msra.gmra.mrb[28].mxu0 %vm1914_vm3, %v2094_v40 }
 0x4d5   : > { %v3399_v43 = vunpack.i.h.bf16 %v3395_v42  ;;  %v3396_v46 = vunpack.i.l.bf16 %v3395_v42  ;;  %3123 = vmatprep.mubr.msk.bf16.mxu1 %vm3603_vm1, %v3602_v3  ;;  %3129 = vmatprep.mubr.msk.bf16.mxu0 %vm3603_vm1, %v3602_v3 }
 0x4d7   : > { %v1509_v51 = vpack.c.bf16 %v3396_v46, %v3391_v41  ;;  %v1510_v52 = vpack.c.bf16 %v3399_v43, %v3394_v60 }
 0x4d8   : > { %v3402_v55 = vpop.trf.xlu0 }
 0x4d9   : > { %3122 = vmatpush3.bf16.msra.mxu1 %v1509_v51  ;;  %3128 = vmatpush3.bf16.msra.mxu0 %v1510_v52  ;;  %v3406_v59 = vunpack.i.h.bf16 %v3402_v55  ;;  %v3403_v63 = vunpack.i.l.bf16 %v3402_v55  ;;  %v3473_v55 = vld [vmem:[%s4090_s5 + $0x8] sm:$0xff]  }
 0x4da   : > { %3133 = vmatprep.subr.bf16.mxu1 %v3602_v3  ;;  %3139 = vmatprep.subr.bf16.mxu0 %v3602_v3 }
 0x4dc   : > { %v3407_v4 = vpop.trf.xlu0  ;;  %3124 = vmatmul.mubr.msk.bf16.vlgmr.msra.gmra.mrb[28].mxu1 %vm1914_vm3, %v2095_v35  ;;  %3130 = vmatmul.mubr.msk.bf16.vlgmr.msra.gmra.mrb[32].mxu0 %vm1914_vm3, %v2096_v61 }
 0x4dd   : > { %v3411_v1 = vunpack.i.h.bf16 %v3407_v4  ;;  %v3408_v44 = vunpack.i.l.bf16 %v3407_v4  ;;  %3135 = vmatprep.mubr.msk.bf16.mxu1 %vm3603_vm1, %v3602_v3  ;;  %3141 = vmatprep.mubr.msk.bf16.mxu0 %vm3603_vm1, %v3602_v3 }
 0x4df   : > { %v1511_v7 = vpack.c.bf16 %v3408_v44, %v3403_v63  ;;  %v1512_v8 = vpack.c.bf16 %v3411_v1, %v3406_v59  ;;  %v2966_v1 = vld [vmem:[%s4091_s6] ss:$0 sm:$0xff] }
 0x4e1   : > { %3134 = vmatpush3.bf16.msra.mxu1 %v1511_v7  ;;  %3140 = vmatpush3.bf16.msra.mxu0 %v1512_v8 }
 0x4e2   : > { %3145 = vmatprep.subr.bf16.mxu1 %v3472_v31 }
 0x4e4   : > { %3136 = vmatmul.mubr.msk.bf16.vlgmr.msra.gmra.mrb[32].mxu1 %vm1914_vm3, %v2097_v22  ;;  %3142 = vmatmul.mubr.msk.bf16.vlgmr.msra.gmra.mrb[36].mxu0 %vm1914_vm3, %v2098_v57 }
 0x4e5   : > { %3146 = vmatpush3.bf16.msra.mxu1 %v3472_v31 }
 0x4e6   : > { %3147 = vmatprep.subr.bf16.mxu1 %v3473_v55 }
 0x4e9   : > { %3148 = vmatpush3.bf16.msra.mxu1 %v3473_v55 }
 0x59f   : > { %v2136_v23 = vpop.f32.mrb[20].mxu1  ;;  %v2180_v3 = vpop.f32.mrb[24].mxu0 }
 0x5a0   : > { %v3101_v2 = vpop.f32.mrb[21].mxu1  ;;  %v3107_v45 = vpop.f32.mrb[25].mxu0 }
 0x5a1   : > { %v2139_v12 = vpop.f32.mrb[22].mxu1  ;;  %v2183_v14 = vpop.f32.mrb[26].mxu0 }
 0x5a2   : > { %v3102_v15 = vpop.f32.mrb[23].mxu1  ;;  %v3108_v19 = vpop.f32.mrb[27].mxu0 }
 0x5a7   : > { %v2224_v25 = vpop.f32.mrb[24].mxu1  ;;  %v2268_v39 = vpop.f32.mrb[28].mxu0 }
 0x5a8   : > { %v3113_v26 = vpop.f32.mrb[25].mxu1  ;;  %v3119_v49 = vpop.f32.mrb[29].mxu0 }
 0x5a9   : > { %v2227_v13 = vpop.f32.mrb[26].mxu1  ;;  %v2271_v29 = vpop.f32.mrb[30].mxu0 }
 0x5aa   : > { %v3114_v28 = vpop.f32.mrb[27].mxu1  ;;  %v3120_v10 = vpop.f32.mrb[31].mxu0 }
 0x5af   : > { %v2312_v30 = vpop.f32.mrb[28].mxu1  ;;  %v2356_v24 = vpop.f32.mrb[32].mxu0 }
 0x5b0   : > { %v3412_v17 = vpack.i.bf16 %v2312_v30, %v2136_v23  ;;  %v3421_v20 = vpack.i.bf16 %v2356_v24, %v2180_v3  ;;  %v3125_v11 = vpop.f32.mrb[29].mxu1  ;;  %v3131_v58 = vpop.f32.mrb[33].mxu0 }
 0x5b1   : > { %v2315_v0 = vpop.f32.mrb[30].mxu1  ;;  %v2359_v32 = vpop.f32.mrb[34].mxu0 }
 0x5b2   : > { %v3414_v33 = vpack.i.bf16 %v2315_v0, %v2139_v12  ;;  %v3423_v9 = vpack.i.bf16 %v2359_v32, %v2183_v14  ;;  %v3132_v18 = vpop.f32.mrb[35].mxu0  ;;  %3413 = vxpose.xlu0.b32.start [1/2] (short) (narrow) %v3412_v17, 8  ;;  %v3126_v37 = vpop.f32.mrb[31].mxu1 }
 0x5b6   : > { %3415 = vxpose.xlu0.b32.end [2/2] (short) (narrow) %v3414_v33, 8 }
 0x5b7   : > { %v2400_v38 = vpop.f32.mrb[32].mxu1  ;;  %v2444_v40 = vpop.f32.mrb[36].mxu0 }
 0x5b8   : > { %v3430_v47 = vpack.i.bf16 %v2400_v38, %v2224_v25  ;;  %v3439_v34 = vpack.i.bf16 %v2444_v40, %v2268_v39  ;;  %v3137_v60 = vpop.f32.mrb[33].mxu1  ;;  %v3143_v41 = vpop.f32.mrb[37].mxu0 }
 0x5b9   : > { %v2403_v42 = vpop.f32.mrb[34].mxu1  ;;  %v2447_v27 = vpop.f32.mrb[38].mxu0 }
 0x5ba   : > { %v3432_v43 = vpack.i.bf16 %v2403_v42, %v2227_v13  ;;  %v3441_v46 = vpack.i.bf16 %v2447_v27, %v2271_v29  ;;  %v3144_v21 = vpop.f32.mrb[39].mxu0  ;;  %3422 = vxpose.xlu0.b32.start [1/2] (short) (narrow) %v3421_v20, 8  ;;  %v3138_v48 = vpop.f32.mrb[35].mxu1 }
 0x5be   : > { %3424 = vxpose.xlu0.b32.end [2/2] (short) (narrow) %v3423_v9, 8 }
 0x5c2   : > { %3431 = vxpose.xlu0.b32.start [1/2] (short) (narrow) %v3430_v47, 8 }
 0x5c6   : > { %3433 = vxpose.xlu0.b32.end [2/2] (short) (narrow) %v3432_v43, 8 }
 0x5ca   : > { %3440 = vxpose.xlu0.b32.start [1/2] (short) (narrow) %v3439_v34, 8 }
 0x5ce   : > { %3442 = vxpose.xlu0.b32.end [2/2] (short) (narrow) %v3441_v46, 8 }
 0x632   : > { %v3416_v51 = vpop.trf.xlu0 }
 0x633   : > { %3449 = vxpose.xlu1.b32.start [1/4] (short) (narrow) %v3416_v51, 16 }
 0x63a   : > { %v3425_v52 = vpop.trf.xlu0 }
 0x63b   : > { %3451 = vxpose.xlu1.b32.cont [2/4] (short) (narrow) %v3425_v52, 16 }
 0x642   : > { %v3434_v54 = vpop.trf.xlu0 }
 0x643   : > { %3453 = vxpose.xlu1.b32.cont [3/4] (short) (narrow) %v3434_v54, 16 }
 0x64a   : > { %v3443_v56 = vpop.trf.xlu0 }
 0x64b   : > { %3455 = vxpose.xlu1.b32.end [4/4] (short) (narrow) %v3443_v56, 16 }
 0x6bf   : > { %v3456_v35 = vpop.trf.xlu1 }
 0x6c0   : > { %v3460_v61 = vunpack.i.h.bf16 %v3456_v35  ;;  %v3457_v62 = vunpack.i.l.bf16 %v3456_v35 }
 0x6c3   : > { %v3461_v59 = vpop.trf.xlu1 }
 0x6c4   : > { %v3465_v63 = vunpack.i.h.bf16 %v3461_v59  ;;  %v3462_v6 = vunpack.i.l.bf16 %v3461_v59 }
 0x6c6   : > { %v2771_v4 = vpack.c.bf16 %v3462_v6, %v3457_v62  ;;  %v2772_v53 = vpack.c.bf16 %v3465_v63, %v3460_v61 }
 0x6c8   : > { %3149 = vmatprep.mubr.msk.bf16.mxu1 %vm335_vm0, %v2771_v4 }
 0x6c9   : > { %3150 = vmatmul.mubr.msk.bf16.vlgmr.msra.gmra.mrb[36].mxu1 %vm335_vm0, %v2772_v53 }
 0x79c   : > { %v3151_v44 = vpop.f32.mrb[36].mxu1 }
 0x79d   : > { %v2845_v5 = vadd.f32 %v3151_v44, %v2966_v1  ;;  %v2836_v36 = vpop.f32.mrb[37].mxu1 }
 0x79e   : > { %v2837_v7 = vadd.f32 %v2966_v1, %v2836_v36  ;;  %v3152_v8 = vpop.f32.mrb[38].mxu1 }
 0x79f   : > { %2853 = vst [vmem:[%s299_s21 + $0x10] sm:$0xff] %v2845_v5  ;;  %v2848_v50 = vadd.f32 %v3152_v8, %v2966_v1  ;;  %v2839_v16 = vpop.f32.mrb[39].mxu1 }
 0x7a0   : > { %2851 = vst [vmem:[%s299_s21] sm:$0xff] %v2837_v7  ;;  %v2840_v22 = vadd.f32 %v2966_v1, %v2839_v16 }
 0x7a1   : > { %2854 = vst [vmem:[%s299_s21 + $0x18] sm:$0xff] %v2848_v50 }
 0x7a2   : > { %2852 = vst [vmem:[%s299_s21 + $0x8] sm:$0xff] %v2840_v22 }
 0x7a3   : > { %3551 = shalt.err (!%p3548_p3)
}
 0x7a4   : > { %s3552_s17 = scalar_lea.hbm %s4042_s26, 512  ;;  %s3556_s21 = scalar_lea.hbm %s4093_s8, 2048 }
 0x7a5   : > { %p3553_p4 = scmp.ne.s32.totalorder %s4042_s26, %s3552_s17  ;;  %p3557_p9 = scmp.lt.u32.totalorder %s4042_s26, %s4093_s8 }
 0x7a6   : > { %p3558_p10 = scmp.lt.u32.totalorder %s3556_s21, %s3552_s17  ;;  %p3560_p12 = scmp.lt.u32.totalorder %s3552_s17, %s4042_s26 }
 0x7a7   : > { %p3554_p7 = pnand %p3553_p4, %p3690_p5 }
 0x7a8   : > { %p3559_p11 = por %p3558_p10, %p3557_p9 }
 0x7a9   : > { %p3555_p8 = pneg %p3554_p7 }
 0x7aa   : > { %p3561_p13 = por %p3560_p12, %p3559_p11 }
 0x7ac   : > { %p3562_p0 = pnand %p3561_p13, %p3555_p8 }
 0x7ae   : > { %3565 = shalt.err (!%p3562_p0)
}
 0x7af   : > { %s3605_s25 = smov 128   ;;  %s3606_s10 = smov 8  }
 0x7b0   : > { %3153 = dma.vmem_to_hbm [thread:$0]  (%p3690_p5), %s4037_s22, 512, %s4042_s26, %s4044_s9, %s3605_s25, %s3605_s25, %s3606_s10  }
 0x7b1 PF: > { %p3159_p1 = scmp.ge.s32.totalorder %s3600_s30, 2  ;;  %s2884_s12 = sand.u32 1, %s3588_s27  }
 0x7b2   : > { %s2885_s13 = scalar_lea.sflag [#allocation3], %s2884_s12 }
 0x7b3   : > { %p3156_p2 = pnand %p3159_p1, %p3694_p6 }
 0x7b5   : > { %3583 = dma.done.wait (!%p3156_p2), %s2885_s13, 512  }
 0x7b6   : > { %3585 = vsyncadd (!%p3156_p2), %s2885_s13, 4294966784  ;;  %p18_p3 = scmp.ge.s32.totalorder %s3677_s11, 6   ;;  %s4096_s27 = smov %s3592_s28 }
 0x7b7   : > { %s4097_s28 = smov %s3596_s29  ;;  %s4098_s29 = smov %s3688_s14 }
 0x7b8   : > { %s4099_s30 = smov %s3677_s11  ;;  %20 = sbr.rel (!%p18_p3) target bundleno = 3 (0x3), region = 87 }
 0x7bf   :  { %2890 = vsyncpa [#allocation3], 1 }
 0x7c0   :  { %2892 = vsyncpa [#allocation3 + $0x1], 1 }

</bundles_post_ra>
